<compile_context>
chip_gen: v6e
topology: v6e:2x2x1
jax: 0.10.0
libtpu: 0.0.40
codegen_flags: <defaults>
</compile_context>

<pallas_src>
import numpy as np
import jax
import jax.numpy as jnp
from jax.experimental import pallas as pl
from jax.experimental.pallas import tpu as pltpu


# ---------------------------------------------------------------------------
# Fused kernel factory: one grid step == `blk` images.
# Per-image activation layout (rows = height, cols = (channel, width)):
#   x  : (32, 32)   [h, w]
#   y1 : (28, 168)  [oh, (co, ow)]   conv1 + ReLU
#   p1 : (14, 84)   [ph, (c, pw)]    pool1
#   y2 : (10, 160)  [oh, (co, ow)]   conv2 + ReLU
#   p2 : (5, 80)    [ph, (c, pw)]    pool2
# Batched tail: feat (blk,400) -> fc3 (blk,120) -> fc4 (blk,84) -> fc5/fc6 VPU.
# ---------------------------------------------------------------------------
def _make_kernel(blk):
    bf16 = jnp.bfloat16

    def dot(a, b):
        return jnp.dot(a, b, preferred_element_type=jnp.float32)

    def pair_max_lanes(y):
        # shifted[:, l] = y[:, l + 1]; the wrapped last lane is never picked
        # by the (even-lane) compaction matmul that follows.
        shifted = jnp.concatenate([y[:, 1:], y[:, :1]], axis=1)
        return jnp.maximum(y, shifted)

    def kernel(x_ref, a1_ref, b1_ref, c1_ref, r1_ref,
               a2_ref, b2_ref, c2_ref, r2_ref,
               w3_ref, b3_ref, w4_ref, b4_ref,
               w5_ref, b5_ref, w6_ref, b6_ref, o_ref):
        feat_rows = []
        for b in range(blk):                               # static, unrolled
            xt = x_ref[b]                                  # (32, 32) f32

            # conv1 + bias + ReLU: one K=160 GEMM against the shift slab.
            lhs1 = jnp.concatenate([xt[j:j + 28, :] for j in range(5)],
                                   axis=1).astype(bf16)    # (28, 160)
            y1 = jnp.maximum(dot(lhs1, a1_ref[...]) + b1_ref[...], 0.0)

            # pool1: VPU lane pair-max + one compaction dot + 2 row-selector dots.
            m1 = pair_max_lanes(y1).astype(bf16)           # (28, 168)
            mc1 = dot(m1, c1_ref[...]).astype(bf16)        # (28, 84)
            p1 = jnp.maximum(dot(r1_ref[0], mc1), dot(r1_ref[1], mc1))  # (14, 84)

            # conv2 + bias + ReLU: one K=420 GEMM.
            lhs2 = jnp.concatenate([p1[j:j + 10, :] for j in range(5)],
                                   axis=1).astype(bf16)    # (10, 420)
            y2 = jnp.maximum(dot(lhs2, a2_ref[...]) + b2_ref[...], 0.0)

            # pool2.
            m2 = pair_max_lanes(y2).astype(bf16)           # (10, 160)
            mc2 = dot(m2, c2_ref[...]).astype(bf16)        # (10, 80)
            p2 = jnp.maximum(dot(r2_ref[0], mc2), dot(r2_ref[1], mc2))  # (5, 80)

            # Flatten to one 400-lane row (order matches the permuted fc3 weight).
            feat_rows.append(
                jnp.concatenate([p2[ph:ph + 1, :] for ph in range(5)], axis=1))

        feat = jnp.concatenate(feat_rows, axis=0).astype(bf16)        # (blk, 400)

        # fc3 / fc4 as real M=blk GEMMs.
        h3 = jnp.maximum(dot(feat, w3_ref[...]) + b3_ref[...], 0.0)   # (blk, 120)
        h4 = jnp.maximum(dot(h3.astype(bf16), w4_ref[...]) + b4_ref[...], 0.0)

        # fc5 (84->2) + fc6 (2->10) on the VPU: K/N too small for the MXU.
        h5a = jnp.sum(h4 * w5_ref[0:1, :], axis=-1, keepdims=True) + b5_ref[:, 0:1]
        h5b = jnp.sum(h4 * w5_ref[1:2, :], axis=-1, keepdims=True) + b5_ref[:, 1:2]
        h5a = jnp.maximum(h5a, 0.0)
        h5b = jnp.maximum(h5b, 0.0)
        o_ref[0] = h5a * w6_ref[0:1, :] + h5b * w6_ref[1:2, :] + b6_ref[...]

    return kernel


# ---------------------------------------------------------------------------
# Trace-time weight restructuring (tiny arrays; traceable under jit).
# ---------------------------------------------------------------------------
def _conv_slab(w, w_in):
    """OIHW weights -> (KH*C_in*W_in, C_out*OW) slab such that
    concat_kh(F[kh:kh+OH, :]) @ slab == conv(F) in the [h, (c, w)] layout."""
    c_out, c_in, kh, kw = w.shape
    ow = w_in - kw + 1
    wi = np.arange(w_in)
    oi = np.arange(ow)
    diff = wi[:, None] - oi[None, :]                      # (w_in, ow) = w - o
    mask = jnp.asarray(((diff >= 0) & (diff < kw)).astype(np.float32))
    idx = np.clip(diff, 0, kw - 1)
    t = w[:, :, :, idx] * mask                            # (c_out, c_in, kh, w_in, ow)
    t = jnp.transpose(t, (2, 1, 3, 0, 4))                 # (kh, c_in, w_in, c_out, ow)
    return t.reshape(kh * c_in * w_in, c_out * ow).astype(jnp.bfloat16)


def _pool_mats(c, size):
    """0/1 selectors for a 2x2 stride-2 max pool in the [h, (c, w)] layout."""
    half = size // 2
    csel = np.zeros((c * size, c * half), np.float32)     # even-lane compaction
    for ci in range(c):
        for p in range(half):
            csel[ci * size + 2 * p, ci * half + p] = 1.0
    rsel = np.zeros((2, half, size), np.float32)          # even/odd row selectors
    for p in range(half):
        rsel[0, p, 2 * p] = 1.0
        rsel[1, p, 2 * p + 1] = 1.0
    return jnp.asarray(csel, jnp.bfloat16), jnp.asarray(rsel, jnp.bfloat16)


def _fc3_weight(w3):
    """Fold PyTorch's NCHW flatten into fc3: row r = ph*80 + c*5 + pw of the
    returned (400, 120) matrix corresponds to flat index c*25 + ph*5 + pw."""
    ph = np.arange(5)[:, None, None]
    c = np.arange(16)[None, :, None]
    pw = np.arange(5)[None, None, :]
    src = (c * 25 + ph * 5 + pw).reshape(-1)              # (400,) in r-order
    return w3.T[src, :].astype(jnp.bfloat16)


def _prepare_operands(p):
    f32 = jnp.float32
    a1 = _conv_slab(p["w1"], 32)                          # (160, 168) bf16
    b1 = jnp.repeat(p["b1"], 28)[None, :].astype(f32)     # (1, 168)
    c1, r1 = _pool_mats(6, 28)                            # (168,84), (2,14,28)
    a2 = _conv_slab(p["w2"], 14)                          # (420, 160) bf16
    b2 = jnp.repeat(p["b2"], 10)[None, :].astype(f32)     # (1, 160)
    c2, r2 = _pool_mats(16, 10)                           # (160,80), (2,5,10)
    w3 = _fc3_weight(p["w3"])                             # (400, 120) bf16
    b3 = p["b3"][None, :].astype(f32)
    w4 = p["w4"].T.astype(jnp.bfloat16)                   # (120, 84)
    b4 = p["b4"][None, :].astype(f32)
    w5 = p["w5"].astype(f32)                              # (2, 84)  VPU
    b5 = p["b5"][None, :].astype(f32)                     # (1, 2)
    w6 = p["w6"].T.astype(f32)                            # (2, 10)  VPU
    b6 = p["b6"][None, :].astype(f32)
    return (a1, b1, c1, r1, a2, b2, c2, r2, w3, b3, w4, b4, w5, b5, w6, b6)


def _pick_block(n):
    # 8 images/step once the batch is large enough; otherwise keep >=2 grid
    # steps where possible (v7x megacore), since 'parallel' shards the grid.
    if n >= 16:
        return 8
    return max(1, n // 2)


# ---------------------------------------------------------------------------
# Forward (matches LeNet5_2neurons.forward with out_feat=False)
# ---------------------------------------------------------------------------
def lenet5_2neurons_forward(x, params, block=None):
    n = x.shape[0]
    assert x.shape[1:] == (1, 32, 32)
    blk = _pick_block(n) if block is None else block
    g = pl.cdiv(n, blk)
    n_pad = g * blk
    xs = x.reshape(n, 32, 32)                             # consume NCHW directly
    if n_pad != n:
        xs = jnp.pad(xs, ((0, n_pad - n), (0, 0), (0, 0)))
    ops = _prepare_operands(params)

    def const_spec(a):
        nd = a.ndim
        return pl.BlockSpec(a.shape, lambda i, _nd=nd: (0,) * _nd)

    out = pl.pallas_call(
        _make_kernel(blk),
        out_shape=jax.ShapeDtypeStruct((g, blk, 10), jnp.float32),
        grid=(g,),
        in_specs=[pl.BlockSpec((blk, 32, 32), lambda i: (i, 0, 0))]
                 + [const_spec(a) for a in ops],
        out_specs=pl.BlockSpec((1, blk, 10), lambda i: (i, 0, 0)),
        compiler_params=pltpu.CompilerParams(
            dimension_semantics=("parallel",)),
    )(xs, *ops)
    return out.reshape(n_pad, 10)[:n]


# ---------------------------------------------------------------------------
# Deterministic parameters in PyTorch layouts (OIHW conv, (out,in) linear)
# ---------------------------------------------------------------------------
def init_params(key):
    ks = jax.random.split(key, 12)

    def u(k, shape, fan_in):
        bound = 1.0 / np.sqrt(float(fan_in))
        return jax.random.uniform(k, shape, jnp.float32, -bound, bound)

    return {
        "w1": u(ks[0], (6, 1, 5, 5), 25),   "b1": u(ks[1], (6,), 25),
        "w2": u(ks[2], (16, 6, 5, 5), 150), "b2": u(ks[3], (16,), 150),
        "w3": u(ks[4], (120, 400), 400),    "b3": u(ks[5], (120,), 400),
        "w4": u(ks[6], (84, 120), 120),     "b4": u(ks[7], (84,), 120),
        "w5": u(ks[8], (2, 84), 84),        "b5": u(ks[9], (2,), 84),
        "w6": u(ks[10], (10, 2), 2),        "b6": u(ks[11], (10,), 2),
    }


# Pure-JAX reference (lax.conv / reduce_window) for a correctness check.
def reference_forward(x, p):
    dn = ("NCHW", "OIHW", "NCHW")
    hp = jax.lax.Precision.HIGHEST
    y = jax.lax.conv_general_dilated(x, p["w1"], (1, 1), "VALID",
                                     dimension_numbers=dn, precision=hp)
    y = jnp.maximum(y + p["b1"][None, :, None, None], 0.0)
    y = jax.lax.reduce_window(y, -jnp.inf, jax.lax.max,
                              (1, 1, 2, 2), (1, 1, 2, 2), "VALID")
    y = jax.lax.conv_general_dilated(y, p["w2"], (1, 1), "VALID",
                                     dimension_numbers=dn, precision=hp)
    y = jnp.maximum(y + p["b2"][None, :, None, None], 0.0)
    y = jax.lax.reduce_window(y, -jnp.inf, jax.lax.max,
                              (1, 1, 2, 2), (1, 1, 2, 2), "VALID")
    feat = y.reshape(y.shape[0], -1)
    h = jnp.maximum(jnp.dot(feat, p["w3"].T, precision=hp) + p["b3"], 0.0)
    h = jnp.maximum(jnp.dot(h, p["w4"].T, precision=hp) + p["b4"], 0.0)
    h = jnp.maximum(jnp.dot(h, p["w5"].T, precision=hp) + p["b5"], 0.0)
    return jnp.dot(h, p["w6"].T, precision=hp) + p["b6"]


if __name__ == "__main__":
    key = jax.random.PRNGKey(0)
    pkey, xkey = jax.random.split(key)
    params = init_params(pkey)

    # LeNet-5 requires 32x32 single-channel input (fc3 expects 16*5*5 = 400).
    x = jax.random.normal(xkey, (2, 1, 32, 32), jnp.float32)

    fwd = jax.jit(lenet5_2neurons_forward)
    out = jax.block_until_ready(fwd(x, params))
    ref = jax.block_until_ready(reference_forward(x, params))

    assert out.shape == (2, 10)
    assert jnp.allclose(out, ref, rtol=2e-2, atol=2e-2), (out, ref)
    print("KERNEL_OK")
</pallas_src>

<mosaic_0001>
module attributes {stable_mosaic.version = 11 : i64} {
  func.func @kernel(%arg0: i32, %arg1: memref<1x32x32xf32, #tpu.memory_space<vmem>>, %arg2: memref<160x168xbf16, #tpu.memory_space<vmem>>, %arg3: memref<1x168xf32, #tpu.memory_space<vmem>>, %arg4: memref<168x84xbf16, #tpu.memory_space<vmem>>, %arg5: memref<2x14x28xbf16, #tpu.memory_space<vmem>>, %arg6: memref<420x160xbf16, #tpu.memory_space<vmem>>, %arg7: memref<1x160xf32, #tpu.memory_space<vmem>>, %arg8: memref<160x80xbf16, #tpu.memory_space<vmem>>, %arg9: memref<2x5x10xbf16, #tpu.memory_space<vmem>>, %arg10: memref<400x120xbf16, #tpu.memory_space<vmem>>, %arg11: memref<1x120xf32, #tpu.memory_space<vmem>>, %arg12: memref<120x84xbf16, #tpu.memory_space<vmem>>, %arg13: memref<1x84xf32, #tpu.memory_space<vmem>>, %arg14: memref<2x84xf32, #tpu.memory_space<vmem>>, %arg15: memref<1x2xf32, #tpu.memory_space<vmem>>, %arg16: memref<2x10xf32, #tpu.memory_space<vmem>>, %arg17: memref<1x10xf32, #tpu.memory_space<vmem>>, %arg18: memref<1x1x10xf32, #tpu.memory_space<vmem>>) attributes {dimension_semantics = [#tpu.dimension_semantics<parallel>], iteration_bounds = array<i64: 2>, scalar_prefetch = 0 : i64, scratch_operands = 0 : i64, tpu.core_type = #tpu.core_type<tc>, window_params = [{transform_indices = @transform_0, window_bounds = array<i64: 1, 32, 32>}, {pipeline_mode = #tpu.pipeline_mode<synchronous>, transform_indices = @transform_1, window_bounds = array<i64: 160, 168>}, {pipeline_mode = #tpu.pipeline_mode<synchronous>, transform_indices = @transform_2, window_bounds = array<i64: 1, 168>}, {pipeline_mode = #tpu.pipeline_mode<synchronous>, transform_indices = @transform_3, window_bounds = array<i64: 168, 84>}, {pipeline_mode = #tpu.pipeline_mode<synchronous>, transform_indices = @transform_4, window_bounds = array<i64: 2, 14, 28>}, {pipeline_mode = #tpu.pipeline_mode<synchronous>, transform_indices = @transform_5, window_bounds = array<i64: 420, 160>}, {pipeline_mode = #tpu.pipeline_mode<synchronous>, transform_indices = @transform_6, window_bounds = array<i64: 1, 160>}, {pipeline_mode = #tpu.pipeline_mode<synchronous>, transform_indices = @transform_7, window_bounds = array<i64: 160, 80>}, {pipeline_mode = #tpu.pipeline_mode<synchronous>, transform_indices = @transform_8, window_bounds = array<i64: 2, 5, 10>}, {pipeline_mode = #tpu.pipeline_mode<synchronous>, transform_indices = @transform_9, window_bounds = array<i64: 400, 120>}, {pipeline_mode = #tpu.pipeline_mode<synchronous>, transform_indices = @transform_10, window_bounds = array<i64: 1, 120>}, {pipeline_mode = #tpu.pipeline_mode<synchronous>, transform_indices = @transform_11, window_bounds = array<i64: 120, 84>}, {pipeline_mode = #tpu.pipeline_mode<synchronous>, transform_indices = @transform_12, window_bounds = array<i64: 1, 84>}, {pipeline_mode = #tpu.pipeline_mode<synchronous>, transform_indices = @transform_13, window_bounds = array<i64: 2, 84>}, {pipeline_mode = #tpu.pipeline_mode<synchronous>, transform_indices = @transform_14, window_bounds = array<i64: 1, 2>}, {pipeline_mode = #tpu.pipeline_mode<synchronous>, transform_indices = @transform_15, window_bounds = array<i64: 2, 10>}, {pipeline_mode = #tpu.pipeline_mode<synchronous>, transform_indices = @transform_16, window_bounds = array<i64: 1, 10>}, {transform_indices = @transform_17, window_bounds = array<i64: 1, 1, 10>}]} {
    %c0 = arith.constant 0 : index
    %c0_0 = arith.constant 0 : index
    %c0_1 = arith.constant 0 : index
    %0 = vector.load %arg1[%c0, %c0_0, %c0_1] : memref<1x32x32xf32, #tpu.memory_space<vmem>>, vector<1x32x32xf32>
    %1 = vector.shape_cast %0 : vector<1x32x32xf32> to vector<32x32xf32>
    %2 = vector.extract_strided_slice %1 {offsets = [0, 0], sizes = [28, 32], strides = [1, 1]} : vector<32x32xf32> to vector<28x32xf32>
    %3 = vector.extract_strided_slice %1 {offsets = [1, 0], sizes = [28, 32], strides = [1, 1]} : vector<32x32xf32> to vector<28x32xf32>
    %4 = vector.extract_strided_slice %1 {offsets = [2, 0], sizes = [28, 32], strides = [1, 1]} : vector<32x32xf32> to vector<28x32xf32>
    %5 = vector.extract_strided_slice %1 {offsets = [3, 0], sizes = [28, 32], strides = [1, 1]} : vector<32x32xf32> to vector<28x32xf32>
    %6 = vector.extract_strided_slice %1 {offsets = [4, 0], sizes = [28, 32], strides = [1, 1]} : vector<32x32xf32> to vector<28x32xf32>
    %7 = tpu.concatenate %2, %3, %4, %5, %6 in 1 : vector<28x32xf32>, vector<28x32xf32>, vector<28x32xf32>, vector<28x32xf32>, vector<28x32xf32> -> vector<28x160xf32>
    %8 = arith.truncf %7 : vector<28x160xf32> to vector<28x160xbf16>
    %c0_2 = arith.constant 0 : index
    %c0_3 = arith.constant 0 : index
    %9 = vector.load %arg2[%c0_2, %c0_3] : memref<160x168xbf16, #tpu.memory_space<vmem>>, vector<160x168xbf16>
    %cst = arith.constant dense<0.000000e+00> : vector<28x168xf32>
    %10 = tpu.matmul %8, %9, %cst {dimension_numbers = #tpu.dot_dimension_numbers<[1], [0], [0], [1], [0, 0, 1, 1], [], []>} : vector<28x160xbf16>, vector<160x168xbf16>, vector<28x168xf32> -> vector<28x168xf32>
    %c0_4 = arith.constant 0 : index
    %c0_5 = arith.constant 0 : index
    %11 = vector.load %arg3[%c0_4, %c0_5] : memref<1x168xf32, #tpu.memory_space<vmem>>, vector<1x168xf32>
    %12 = vector.broadcast %11 : vector<1x168xf32> to vector<28x168xf32>
    %13 = arith.addf %10, %12 : vector<28x168xf32>
    %cst_6 = arith.constant 0.000000e+00 : f32
    %14 = vector.broadcast %cst_6 : f32 to vector<28x168xf32>
    %15 = arith.maximumf %13, %14 : vector<28x168xf32>
    %16 = vector.extract_strided_slice %15 {offsets = [0, 1], sizes = [28, 167], strides = [1, 1]} : vector<28x168xf32> to vector<28x167xf32>
    %17 = vector.extract_strided_slice %15 {offsets = [0, 0], sizes = [28, 1], strides = [1, 1]} : vector<28x168xf32> to vector<28x1xf32>
    %18 = tpu.concatenate %16, %17 in 1 : vector<28x167xf32>, vector<28x1xf32> -> vector<28x168xf32>
    %19 = arith.maximumf %15, %18 : vector<28x168xf32>
    %20 = arith.truncf %19 : vector<28x168xf32> to vector<28x168xbf16>
    %c0_7 = arith.constant 0 : index
    %c0_8 = arith.constant 0 : index
    %21 = vector.load %arg4[%c0_7, %c0_8] : memref<168x84xbf16, #tpu.memory_space<vmem>>, vector<168x84xbf16>
    %cst_9 = arith.constant dense<0.000000e+00> : vector<28x84xf32>
    %22 = tpu.matmul %20, %21, %cst_9 {dimension_numbers = #tpu.dot_dimension_numbers<[1], [0], [0], [1], [0, 0, 1, 1], [], []>} : vector<28x168xbf16>, vector<168x84xbf16>, vector<28x84xf32> -> vector<28x84xf32>
    %23 = arith.truncf %22 : vector<28x84xf32> to vector<28x84xbf16>
    %c0_10 = arith.constant 0 : index
    %c0_11 = arith.constant 0 : index
    %c0_12 = arith.constant 0 : index
    %24 = vector.load %arg5[%c0_10, %c0_11, %c0_12] : memref<2x14x28xbf16, #tpu.memory_space<vmem>>, vector<1x14x28xbf16>
    %25 = vector.shape_cast %24 : vector<1x14x28xbf16> to vector<14x28xbf16>
    %cst_13 = arith.constant dense<0.000000e+00> : vector<14x84xf32>
    %26 = tpu.matmul %25, %23, %cst_13 {dimension_numbers = #tpu.dot_dimension_numbers<[1], [0], [0], [1], [0, 0, 1, 1], [], []>} : vector<14x28xbf16>, vector<28x84xbf16>, vector<14x84xf32> -> vector<14x84xf32>
    %c1 = arith.constant 1 : index
    %c0_14 = arith.constant 0 : index
    %c0_15 = arith.constant 0 : index
    %27 = vector.load %arg5[%c1, %c0_14, %c0_15] : memref<2x14x28xbf16, #tpu.memory_space<vmem>>, vector<1x14x28xbf16>
    %28 = vector.shape_cast %27 : vector<1x14x28xbf16> to vector<14x28xbf16>
    %cst_16 = arith.constant dense<0.000000e+00> : vector<14x84xf32>
    %29 = tpu.matmul %28, %23, %cst_16 {dimension_numbers = #tpu.dot_dimension_numbers<[1], [0], [0], [1], [0, 0, 1, 1], [], []>} : vector<14x28xbf16>, vector<28x84xbf16>, vector<14x84xf32> -> vector<14x84xf32>
    %30 = arith.maximumf %26, %29 : vector<14x84xf32>
    %31 = vector.extract_strided_slice %30 {offsets = [0, 0], sizes = [10, 84], strides = [1, 1]} : vector<14x84xf32> to vector<10x84xf32>
    %32 = vector.extract_strided_slice %30 {offsets = [1, 0], sizes = [10, 84], strides = [1, 1]} : vector<14x84xf32> to vector<10x84xf32>
    %33 = vector.extract_strided_slice %30 {offsets = [2, 0], sizes = [10, 84], strides = [1, 1]} : vector<14x84xf32> to vector<10x84xf32>
    %34 = vector.extract_strided_slice %30 {offsets = [3, 0], sizes = [10, 84], strides = [1, 1]} : vector<14x84xf32> to vector<10x84xf32>
    %35 = vector.extract_strided_slice %30 {offsets = [4, 0], sizes = [10, 84], strides = [1, 1]} : vector<14x84xf32> to vector<10x84xf32>
    %36 = tpu.concatenate %31, %32, %33, %34, %35 in 1 : vector<10x84xf32>, vector<10x84xf32>, vector<10x84xf32>, vector<10x84xf32>, vector<10x84xf32> -> vector<10x420xf32>
    %37 = arith.truncf %36 : vector<10x420xf32> to vector<10x420xbf16>
    %c0_17 = arith.constant 0 : index
    %c0_18 = arith.constant 0 : index
    %38 = vector.load %arg6[%c0_17, %c0_18] : memref<420x160xbf16, #tpu.memory_space<vmem>>, vector<420x160xbf16>
    %cst_19 = arith.constant dense<0.000000e+00> : vector<10x160xf32>
    %39 = tpu.matmul %37, %38, %cst_19 {dimension_numbers = #tpu.dot_dimension_numbers<[1], [0], [0], [1], [0, 0, 1, 1], [], []>} : vector<10x420xbf16>, vector<420x160xbf16>, vector<10x160xf32> -> vector<10x160xf32>
    %c0_20 = arith.constant 0 : index
    %c0_21 = arith.constant 0 : index
    %40 = vector.load %arg7[%c0_20, %c0_21] : memref<1x160xf32, #tpu.memory_space<vmem>>, vector<1x160xf32>
    %41 = vector.broadcast %40 : vector<1x160xf32> to vector<10x160xf32>
    %42 = arith.addf %39, %41 : vector<10x160xf32>
    %cst_22 = arith.constant 0.000000e+00 : f32
    %43 = vector.broadcast %cst_22 : f32 to vector<10x160xf32>
    %44 = arith.maximumf %42, %43 : vector<10x160xf32>
    %45 = vector.extract_strided_slice %44 {offsets = [0, 1], sizes = [10, 159], strides = [1, 1]} : vector<10x160xf32> to vector<10x159xf32>
    %46 = vector.extract_strided_slice %44 {offsets = [0, 0], sizes = [10, 1], strides = [1, 1]} : vector<10x160xf32> to vector<10x1xf32>
    %47 = tpu.concatenate %45, %46 in 1 : vector<10x159xf32>, vector<10x1xf32> -> vector<10x160xf32>
    %48 = arith.maximumf %44, %47 : vector<10x160xf32>
    %49 = arith.truncf %48 : vector<10x160xf32> to vector<10x160xbf16>
    %c0_23 = arith.constant 0 : index
    %c0_24 = arith.constant 0 : index
    %50 = vector.load %arg8[%c0_23, %c0_24] : memref<160x80xbf16, #tpu.memory_space<vmem>>, vector<160x80xbf16>
    %cst_25 = arith.constant dense<0.000000e+00> : vector<10x80xf32>
    %51 = tpu.matmul %49, %50, %cst_25 {dimension_numbers = #tpu.dot_dimension_numbers<[1], [0], [0], [1], [0, 0, 1, 1], [], []>} : vector<10x160xbf16>, vector<160x80xbf16>, vector<10x80xf32> -> vector<10x80xf32>
    %52 = arith.truncf %51 : vector<10x80xf32> to vector<10x80xbf16>
    %c0_26 = arith.constant 0 : index
    %c0_27 = arith.constant 0 : index
    %c0_28 = arith.constant 0 : index
    %53 = vector.load %arg9[%c0_26, %c0_27, %c0_28] : memref<2x5x10xbf16, #tpu.memory_space<vmem>>, vector<1x5x10xbf16>
    %54 = vector.shape_cast %53 : vector<1x5x10xbf16> to vector<5x10xbf16>
    %cst_29 = arith.constant dense<0.000000e+00> : vector<5x80xf32>
    %55 = tpu.matmul %54, %52, %cst_29 {dimension_numbers = #tpu.dot_dimension_numbers<[1], [0], [0], [1], [0, 0, 1, 1], [], []>} : vector<5x10xbf16>, vector<10x80xbf16>, vector<5x80xf32> -> vector<5x80xf32>
    %c1_30 = arith.constant 1 : index
    %c0_31 = arith.constant 0 : index
    %c0_32 = arith.constant 0 : index
    %56 = vector.load %arg9[%c1_30, %c0_31, %c0_32] : memref<2x5x10xbf16, #tpu.memory_space<vmem>>, vector<1x5x10xbf16>
    %57 = vector.shape_cast %56 : vector<1x5x10xbf16> to vector<5x10xbf16>
    %cst_33 = arith.constant dense<0.000000e+00> : vector<5x80xf32>
    %58 = tpu.matmul %57, %52, %cst_33 {dimension_numbers = #tpu.dot_dimension_numbers<[1], [0], [0], [1], [0, 0, 1, 1], [], []>} : vector<5x10xbf16>, vector<10x80xbf16>, vector<5x80xf32> -> vector<5x80xf32>
    %59 = arith.maximumf %55, %58 : vector<5x80xf32>
    %60 = vector.extract_strided_slice %59 {offsets = [0, 0], sizes = [1, 80], strides = [1, 1]} : vector<5x80xf32> to vector<1x80xf32>
    %61 = vector.extract_strided_slice %59 {offsets = [1, 0], sizes = [1, 80], strides = [1, 1]} : vector<5x80xf32> to vector<1x80xf32>
    %62 = vector.extract_strided_slice %59 {offsets = [2, 0], sizes = [1, 80], strides = [1, 1]} : vector<5x80xf32> to vector<1x80xf32>
    %63 = vector.extract_strided_slice %59 {offsets = [3, 0], sizes = [1, 80], strides = [1, 1]} : vector<5x80xf32> to vector<1x80xf32>
    %64 = vector.extract_strided_slice %59 {offsets = [4, 0], sizes = [1, 80], strides = [1, 1]} : vector<5x80xf32> to vector<1x80xf32>
    %65 = tpu.concatenate %60, %61, %62, %63, %64 in 1 : vector<1x80xf32>, vector<1x80xf32>, vector<1x80xf32>, vector<1x80xf32>, vector<1x80xf32> -> vector<1x400xf32>
    %66 = arith.truncf %65 : vector<1x400xf32> to vector<1x400xbf16>
    %c0_34 = arith.constant 0 : index
    %c0_35 = arith.constant 0 : index
    %67 = vector.load %arg10[%c0_34, %c0_35] : memref<400x120xbf16, #tpu.memory_space<vmem>>, vector<400x120xbf16>
    %cst_36 = arith.constant dense<0.000000e+00> : vector<1x120xf32>
    %68 = tpu.matmul %66, %67, %cst_36 {dimension_numbers = #tpu.dot_dimension_numbers<[1], [0], [0], [1], [0, 0, 1, 1], [], []>} : vector<1x400xbf16>, vector<400x120xbf16>, vector<1x120xf32> -> vector<1x120xf32>
    %c0_37 = arith.constant 0 : index
    %c0_38 = arith.constant 0 : index
    %69 = vector.load %arg11[%c0_37, %c0_38] : memref<1x120xf32, #tpu.memory_space<vmem>>, vector<1x120xf32>
    %70 = arith.addf %68, %69 : vector<1x120xf32>
    %cst_39 = arith.constant 0.000000e+00 : f32
    %71 = vector.broadcast %cst_39 : f32 to vector<1x120xf32>
    %72 = arith.maximumf %70, %71 : vector<1x120xf32>
    %73 = arith.truncf %72 : vector<1x120xf32> to vector<1x120xbf16>
    %c0_40 = arith.constant 0 : index
    %c0_41 = arith.constant 0 : index
    %74 = vector.load %arg12[%c0_40, %c0_41] : memref<120x84xbf16, #tpu.memory_space<vmem>>, vector<120x84xbf16>
    %cst_42 = arith.constant dense<0.000000e+00> : vector<1x84xf32>
    %75 = tpu.matmul %73, %74, %cst_42 {dimension_numbers = #tpu.dot_dimension_numbers<[1], [0], [0], [1], [0, 0, 1, 1], [], []>} : vector<1x120xbf16>, vector<120x84xbf16>, vector<1x84xf32> -> vector<1x84xf32>
    %c0_43 = arith.constant 0 : index
    %c0_44 = arith.constant 0 : index
    %76 = vector.load %arg13[%c0_43, %c0_44] : memref<1x84xf32, #tpu.memory_space<vmem>>, vector<1x84xf32>
    %77 = arith.addf %75, %76 : vector<1x84xf32>
    %cst_45 = arith.constant 0.000000e+00 : f32
    %78 = vector.broadcast %cst_45 : f32 to vector<1x84xf32>
    %79 = arith.maximumf %77, %78 : vector<1x84xf32>
    %c0_46 = arith.constant 0 : index
    %c0_47 = arith.constant 0 : index
    %80 = vector.load %arg14[%c0_46, %c0_47] : memref<2x84xf32, #tpu.memory_space<vmem>>, vector<1x84xf32>
    %81 = arith.mulf %79, %80 : vector<1x84xf32>
    %cst_48 = arith.constant dense<0.000000e+00> : vector<1xf32>
    %82 = vector.multi_reduction <add>, %81, %cst_48 [1] : vector<1x84xf32> to vector<1xf32>
    %83 = vector.shape_cast %82 : vector<1xf32> to vector<1x1xf32>
    %c0_49 = arith.constant 0 : index
    %c0_50 = arith.constant 0 : index
    %84 = vector.load %arg15[%c0_49, %c0_50] : memref<1x2xf32, #tpu.memory_space<vmem>>, vector<1x1xf32>
    %85 = arith.addf %83, %84 : vector<1x1xf32>
    %c1_51 = arith.constant 1 : index
    %c0_52 = arith.constant 0 : index
    %86 = vector.load %arg14[%c1_51, %c0_52] : memref<2x84xf32, #tpu.memory_space<vmem>>, vector<1x84xf32>
    %87 = arith.mulf %79, %86 : vector<1x84xf32>
    %cst_53 = arith.constant dense<0.000000e+00> : vector<1xf32>
    %88 = vector.multi_reduction <add>, %87, %cst_53 [1] : vector<1x84xf32> to vector<1xf32>
    %89 = vector.shape_cast %88 : vector<1xf32> to vector<1x1xf32>
    %c0_54 = arith.constant 0 : index
    %c1_55 = arith.constant 1 : index
    %90 = vector.load %arg15[%c0_54, %c1_55] : memref<1x2xf32, #tpu.memory_space<vmem>>, vector<1x1xf32>
    %91 = arith.addf %89, %90 : vector<1x1xf32>
    %cst_56 = arith.constant 0.000000e+00 : f32
    %92 = vector.broadcast %cst_56 : f32 to vector<1x1xf32>
    %93 = arith.maximumf %85, %92 : vector<1x1xf32>
    %cst_57 = arith.constant 0.000000e+00 : f32
    %94 = vector.broadcast %cst_57 : f32 to vector<1x1xf32>
    %95 = arith.maximumf %91, %94 : vector<1x1xf32>
    %c0_58 = arith.constant 0 : index
    %c0_59 = arith.constant 0 : index
    %96 = vector.load %arg16[%c0_58, %c0_59] : memref<2x10xf32, #tpu.memory_space<vmem>>, vector<1x10xf32>
    %97 = vector.broadcast %93 : vector<1x1xf32> to vector<1x10xf32>
    %98 = arith.mulf %97, %96 : vector<1x10xf32>
    %c1_60 = arith.constant 1 : index
    %c0_61 = arith.constant 0 : index
    %99 = vector.load %arg16[%c1_60, %c0_61] : memref<2x10xf32, #tpu.memory_space<vmem>>, vector<1x10xf32>
    %100 = vector.broadcast %95 : vector<1x1xf32> to vector<1x10xf32>
    %101 = arith.mulf %100, %99 : vector<1x10xf32>
    %102 = arith.addf %98, %101 : vector<1x10xf32>
    %c0_62 = arith.constant 0 : index
    %c0_63 = arith.constant 0 : index
    %103 = vector.load %arg17[%c0_62, %c0_63] : memref<1x10xf32, #tpu.memory_space<vmem>>, vector<1x10xf32>
    %104 = arith.addf %102, %103 : vector<1x10xf32>
    %c0_64 = arith.constant 0 : index
    %c0_65 = arith.constant 0 : index
    %c0_66 = arith.constant 0 : index
    %105 = vector.load %arg18[%c0_64, %c0_65, %c0_66] : memref<1x1x10xf32, #tpu.memory_space<vmem>>, vector<1x1x10xf32>
    %106 = vector.shape_cast %105 : vector<1x1x10xf32> to vector<1x10xf32>
    %107 = vector.shape_cast %104 : vector<1x10xf32> to vector<1x1x10xf32>
    tpu.vector_store %arg18[%c0_64, %c0_65, %c0_66], %107 {strides = array<i32>} : memref<1x1x10xf32, #tpu.memory_space<vmem>>, vector<1x1x10xf32>,
    return
  }
  func.func @transform_0(%arg0: i32) -> (i32, i32, i32) {
    %c0_i32 = arith.constant 0 : i32
    %c0_i32_0 = arith.constant 0 : i32
    %c0_i32_1 = arith.constant 0 : i32
    return %arg0, %c0_i32, %c0_i32_0 : i32, i32, i32
  }
  func.func @transform_1(%arg0: i32) -> (i32, i32) {
    %c0_i32 = arith.constant 0 : i32
    %c0_i32_0 = arith.constant 0 : i32
    %c0_i32_1 = arith.constant 0 : i32
    return %c0_i32, %c0_i32_0 : i32, i32
  }
  func.func @transform_2(%arg0: i32) -> (i32, i32) {
    %c0_i32 = arith.constant 0 : i32
    %c0_i32_0 = arith.constant 0 : i32
    %c0_i32_1 = arith.constant 0 : i32
    return %c0_i32, %c0_i32_0 : i32, i32
  }
  func.func @transform_3(%arg0: i32) -> (i32, i32) {
    %c0_i32 = arith.constant 0 : i32
    %c0_i32_0 = arith.constant 0 : i32
    %c0_i32_1 = arith.constant 0 : i32
    return %c0_i32, %c0_i32_0 : i32, i32
  }
  func.func @transform_4(%arg0: i32) -> (i32, i32, i32) {
    %c0_i32 = arith.constant 0 : i32
    %c0_i32_0 = arith.constant 0 : i32
    %c0_i32_1 = arith.constant 0 : i32
    %c0_i32_2 = arith.constant 0 : i32
    return %c0_i32, %c0_i32_0, %c0_i32_1 : i32, i32, i32
  }
  func.func @transform_5(%arg0: i32) -> (i32, i32) {
    %c0_i32 = arith.constant 0 : i32
    %c0_i32_0 = arith.constant 0 : i32
    %c0_i32_1 = arith.constant 0 : i32
    return %c0_i32, %c0_i32_0 : i32, i32
  }
  func.func @transform_6(%arg0: i32) -> (i32, i32) {
    %c0_i32 = arith.constant 0 : i32
    %c0_i32_0 = arith.constant 0 : i32
    %c0_i32_1 = arith.constant 0 : i32
    return %c0_i32, %c0_i32_0 : i32, i32
  }
  func.func @transform_7(%arg0: i32) -> (i32, i32) {
    %c0_i32 = arith.constant 0 : i32
    %c0_i32_0 = arith.constant 0 : i32
    %c0_i32_1 = arith.constant 0 : i32
    return %c0_i32, %c0_i32_0 : i32, i32
  }
  func.func @transform_8(%arg0: i32) -> (i32, i32, i32) {
    %c0_i32 = arith.constant 0 : i32
    %c0_i32_0 = arith.constant 0 : i32
    %c0_i32_1 = arith.constant 0 : i32
    %c0_i32_2 = arith.constant 0 : i32
    return %c0_i32, %c0_i32_0, %c0_i32_1 : i32, i32, i32
  }
  func.func @transform_9(%arg0: i32) -> (i32, i32) {
    %c0_i32 = arith.constant 0 : i32
    %c0_i32_0 = arith.constant 0 : i32
    %c0_i32_1 = arith.constant 0 : i32
    return %c0_i32, %c0_i32_0 : i32, i32
  }
  func.func @transform_10(%arg0: i32) -> (i32, i32) {
    %c0_i32 = arith.constant 0 : i32
    %c0_i32_0 = arith.constant 0 : i32
    %c0_i32_1 = arith.constant 0 : i32
    return %c0_i32, %c0_i32_0 : i32, i32
  }
  func.func @transform_11(%arg0: i32) -> (i32, i32) {
    %c0_i32 = arith.constant 0 : i32
    %c0_i32_0 = arith.constant 0 : i32
    %c0_i32_1 = arith.constant 0 : i32
    return %c0_i32, %c0_i32_0 : i32, i32
  }
  func.func @transform_12(%arg0: i32) -> (i32, i32) {
    %c0_i32 = arith.constant 0 : i32
    %c0_i32_0 = arith.constant 0 : i32
    %c0_i32_1 = arith.constant 0 : i32
    return %c0_i32, %c0_i32_0 : i32, i32
  }
  func.func @transform_13(%arg0: i32) -> (i32, i32) {
    %c0_i32 = arith.constant 0 : i32
    %c0_i32_0 = arith.constant 0 : i32
    %c0_i32_1 = arith.constant 0 : i32
    return %c0_i32, %c0_i32_0 : i32, i32
  }
  func.func @transform_14(%arg0: i32) -> (i32, i32) {
    %c0_i32 = arith.constant 0 : i32
    %c0_i32_0 = arith.constant 0 : i32
    %c0_i32_1 = arith.constant 0 : i32
    return %c0_i32, %c0_i32_0 : i32, i32
  }
  func.func @transform_15(%arg0: i32) -> (i32, i32) {
    %c0_i32 = arith.constant 0 : i32
    %c0_i32_0 = arith.constant 0 : i32
    %c0_i32_1 = arith.constant 0 : i32
    return %c0_i32, %c0_i32_0 : i32, i32
  }
  func.func @transform_16(%arg0: i32) -> (i32, i32) {
    %c0_i32 = arith.constant 0 : i32
    %c0_i32_0 = arith.constant 0 : i32
    %c0_i32_1 = arith.constant 0 : i32
    return %c0_i32, %c0_i32_0 : i32, i32
  }
  func.func @transform_17(%arg0: i32) -> (i32, i32, i32) {
    %c0_i32 = arith.constant 0 : i32
    %c0_i32_0 = arith.constant 0 : i32
    %c0_i32_1 = arith.constant 0 : i32
    return %arg0, %c0_i32, %c0_i32_0 : i32, i32, i32
  }
}

</mosaic_0001>

<bundles_post_ra>
// kernel: lenet5_2neurons_forward.1
= control target key start
LH: loop header
LB: loop body
LE: loop exit
PB: predicated region body
PF: predicated region fallthrough
CT: control target
= control target key end

     0   :  { %s3839_s0 = inlined_call_operand.vmem [shape: f32[2,32,32], index: 0, kind: input, shape index: {}]   ;;  %s3840_s1 = inlined_call_operand.vmem [shape: bf16[160,168], index: 1, kind: input, shape index: {}]   ;;  %s3841_s2 = inlined_call_operand.vmem [shape: f32[1,168], index: 2, kind: input, shape index: {}]   ;;  %s3842_s3 = inlined_call_operand.vmem [shape: bf16[168,84], index: 3, kind: input, shape index: {}]   ;;  %s3843_s4 = inlined_call_operand.vmem [shape: bf16[2,14,28], index: 4, kind: input, shape index: {}]   ;;  %s3844_s5 = inlined_call_operand.vmem [shape: bf16[420,160], index: 5, kind: input, shape index: {}]   ;;  %s3845_s6 = inlined_call_operand.vmem [shape: f32[1,160], index: 6, kind: input, shape index: {}]   ;;  %s3846_s7 = inlined_call_operand.vmem [shape: bf16[160,80], index: 7, kind: input, shape index: {}]   ;;  %s3847_s8 = inlined_call_operand.vmem [shape: bf16[2,5,10], index: 8, kind: input, shape index: {}]   ;;  %s3848_s9 = inlined_call_operand.vmem [shape: bf16[400,120], index: 9, kind: input, shape index: {}]   ;;  %s3849_s10 = inlined_call_operand.vmem [shape: f32[1,120], index: 10, kind: input, shape index: {}]   ;;  %s3850_s11 = inlined_call_operand.vmem [shape: bf16[120,84], index: 11, kind: input, shape index: {}]   ;;  %s3851_s12 = inlined_call_operand.vmem [shape: f32[1,84], index: 12, kind: input, shape index: {}]   ;;  %s3852_s13 = inlined_call_operand.vmem [shape: f32[2,84], index: 13, kind: input, shape index: {}]   ;;  %s3853_s14 = inlined_call_operand.vmem [shape: f32[1,2], index: 14, kind: input, shape index: {}]   ;;  %s3854_s15 = inlined_call_operand.vmem [shape: f32[2,10], index: 15, kind: input, shape index: {}]   ;;  %s3855_s16 = inlined_call_operand.vmem [shape: f32[1,10], index: 16, kind: input, shape index: {}]   ;;  %s3856_s17 = inlined_call_operand.hbm [shape: f32[2,1,10], index: 17, kind: output, shape index: {}]  }
   0x1   :  { %3867 = sst [smem:[#allocation12_spill]] %s3839_s0 }
   0x2   :  { %3868 = sst [smem:[#allocation13_spill]] %s3840_s1 }
   0x3   :  { %3869 = sst [smem:[#allocation14_spill]] %s3841_s2 }
   0x4   :  { %3870 = sst [smem:[#allocation15_spill]] %s3855_s16 }
   0x5   :  { %3871 = sst [smem:[#allocation16_spill]] %s3856_s17 }
   0x6   :  { %22 = vsyncpa [#allocation3], 0 }
   0x7   :  { %24 = vsyncpa [#allocation3 + $0x1], 0  ;;  %s3162_s24 = smov 0   ;;  %s3164_s25 = smov 0  }
   0x8   :  { %s3166_s26 = smov 0   ;;  %s3168_s27 = smov 0  }
   0x9 LB: > { %3872 = sst [smem:[#allocation5_spill]] %s3043_s24  ;;  %s3183_s28 = sadd.s32 4294967295, %s3055_s27   ;;  %s3055_s27 = sphi %s3168_s27, %s3891_s27   ;;  %s3051_s26 = sphi %s3166_s26, %s3893_s26   ;;  %s3047_s25 = sphi %s3164_s25, %s3895_s25   ;;  %s3043_s24 = sphi %s3162_s24, %s3894_s24  }
   0xa   : > { %3873 = sst [smem:[#allocation6_spill]] %s3051_s26  ;;  %s2434_s29 = sadd.s32 4294967294, %s3055_s27  }
   0xb   : > { %3874 = sst [smem:[#allocation7_spill]] %s3055_s27  ;;  %s3187_s0 = sadd.s32 1, %s3055_s27  }
   0xc   : > { %3875 = sst [smem:[#allocation8_spill]] %s3187_s0  ;;  %s399_s30 = sadd.s32 1, %s3051_s26 }
   0xd   : > { %s396_s18 = ssub.s32 %s3055_s27, %s3187_s0  ;;  %p409_p0 = scmp.ne.s32.totalorder %s3051_s26, %s3047_s25 }
   0xe   : > { %p397_p1 = scmp.eq.s32.totalorder %s396_s18, 0  ;;  %p410_p2 = scmp.eq.s32.totalorder %s3183_s28, 1 }
   0xf   : > { %p415_p3 = scmp.ne.s32.totalorder %s3047_s25, %s3043_s24  ;;  %p416_p4 = scmp.eq.s32.totalorder %s2434_s29, 1 }
  0x10   : > { %s3198_s19 = scalar_select %p397_p1, %s3051_s26, %s399_s30  }
  0x11   : > { %p3200_p5 = por %p410_p2, %p409_p0  ;;  %p3204_p6 = por %p416_p4, %p415_p3 }
  0x12   : > { %3876 = sst [smem:[#allocation9_spill]] %s3198_s19  ;;  %p2437_p7 = scmp.ge.s32.totalorder %s3055_s27, 1 }
  0x13   : > { %s3877_s1 = scalar_select %p3200_p5, 1, 0 }
  0x14   : > { %s3879_s20 = scalar_select %p3204_p6, 1, 0 }
  0x15   : > { %3878 = sst [smem:[#allocation10_spill]] %s3877_s1  ;;  %p490_p8 = scmp.lt.s32.totalorder %s3055_s27, 3 }
  0x16   : > { %3880 = sst [smem:[#allocation11_spill]] %s3879_s20 }
  0x17   : > { %p491_p9 = pnand %p2437_p7, %p490_p8 }
  0x18   : > { %p541_p10 = scmp.lt.s32.totalorder (!%p491_p9), %s3183_s28, 1  ;;  %s3881_s23 = sld [smem:[#allocation13_spill]] (!%p491_p9) }
  0x19   : > { %494 = sbr.rel (%p491_p9) target bundleno = 2607 (0xa2f), region = 88  ;;  %s3882_s21 = sld [smem:[#allocation12_spill]] (!%p491_p9) }
  0x1a   : > { %s3057_s19 = smov (!%p491_p9), 32   ;;  %s3058_s1 = smov (!%p491_p9), 96  }
  0x1b   : > { %s3059_s30 = smov (!%p491_p9), 64   ;;  %s3883_s2 = sld [smem:[#allocation14_spill]] (!%p491_p9) }
  0x1c   : > { %s3062_s18 = smov (!%p491_p9), 127   ;;  %s3067_s24 = smov (!%p491_p9), 80  }
  0x1d   : > { %s3068_s26 = smov (!%p491_p9), 124   ;;  %s3069_s17 = smov (!%p491_p9), 31  }
  0x1e   : > { %v2829_v0 = vld [vmem:[%s3881_s23 + $0x74] ss:$8 sps:$4 sm:$0xff]   ;;  %s542_s29 = scalar_select %p541_p10, %s3183_s28, 1  ;;  %v2831_v1 = vld [vmem:[%s3881_s23 + $0x70] ss:$8 sps:$4 sm:$0xff]   ;;  %vm555_vm0 = vcmask 1046528  }
  0x1f   : > { %v2832_v2 = vld [vmem:[%s3881_s23 + $0x64] ss:$8 sps:$4 sm:$0xff]   ;;  %784 = vmatprep.subr.bf16.mxu0 %v2829_v0  ;;  %v2834_v3 = vld [vmem:[%s3881_s23 + $0x60] ss:$8 sps:$4 sm:$0xff]   ;;  %v2835_v4 = vld [vmem:[%s3881_s23 + $0x54] ss:$8 sps:$4 sm:$0xff]  }
  0x20   : > { %s2589_s0 = sshll.u32 %s542_s29, 5  ;;  %785 = vmatpush1.bf16.msra.mxu0 %v2831_v1  ;;  %vm595_vm1 = vcmask 1044480   ;;  %vm575_vm2 = vcmask 1045504   ;;  %v2837_v8 = vld [vmem:[%s3881_s23 + $0x50] ss:$8 sps:$4 sm:$0xff]   ;;  %vm615_vm3 = vcmask 1043456  }
  0x21   : > { %s545_s22 = scalar_lea.vmem %s3882_s21, %s2589_s0  ;;  %786 = vmatprep.subr.bf16.mxu0 %v2832_v2  ;;  %v2838_v22 = vld [vmem:[%s3881_s23 + $0x44] ss:$8 sps:$4 sm:$0xff]   ;;  %v2840_v31 = vld [vmem:[%s3881_s23 + $0x40] ss:$8 sps:$4 sm:$0xff]   ;;  %v2841_v37 = vld [vmem:[%s3881_s23 + $0x34] ss:$8 sps:$4 sm:$0xff]  }
  0x22   : > { %v3230_v5 = vld [vmem:[%s545_s22] sm:$0xff]  ;;  %v3232_v6 = vld [vmem:[%s545_s22 + $0x8] sm:$0xff]  ;;  %v3234_v7 = vld [vmem:[%s545_s22 + $0x10] sm:$0xff]  ;;  %vm627_vm4 = vcmask 261120   ;;  %vm632_vm5 = vcmask 523264   ;;  %vm637_vm6 = vcmask 785408  }
  0x23   : > { %v556_v9 = vrot.slane %v3230_v5, 1  ;;  %v557_v10 = vrot.slane %v3232_v6, 1  ;;  %v559_v11 = vrot.slane %v3234_v7, 1  ;;  %v596_v12 = vrot.slane %v3230_v5, 3  ;;  %v3243_v13 = vld [vmem:[%s545_s22 + $0x18] sm:$0xff]  ;;  %s3061_s29 = smov 39  }
  0x24   : > { %v597_v14 = vrot.slane %v3232_v6, 3  ;;  %v599_v15 = vrot.slane %v3234_v7, 3  ;;  %v576_v16 = vrot.slane %v3230_v5, 2  ;;  %v577_v17 = vrot.slane %v3232_v6, 2  ;;  %787 = vmatpush1.bf16.msra.mxu0 %v2834_v3  ;;  %v2843_v43 = vld [vmem:[%s3881_s23 + $0x30] ss:$8 sps:$4 sm:$0xff]  }
  0x25   : > { %v558_v18 = vsel %vm555_vm0, %v556_v9, %v557_v10  ;;  %v560_v19 = vsel %vm555_vm0, %v557_v10, %v559_v11  ;;  %v579_v20 = vrot.slane %v3234_v7, 2  ;;  %v561_v21 = vrot.slane %v3243_v13, 1  ;;  %788 = vmatprep.subr.bf16.mxu0 %v2835_v4  ;;  %v2844_v46 = vld [vmem:[%s3881_s23 + $0x24] ss:$8 sps:$4 sm:$0xff]   ;;  %v2846_v48 = vld [vmem:[%s3881_s23 + $0x20] ss:$8 sps:$4 sm:$0xff]  }
  0x26   : > { %v2732_v23 = vpack.i.bf16 %v560_v19, %v558_v18  ;;  %v598_v24 = vsel %vm595_vm1, %v596_v12, %v597_v14  ;;  %v600_v25 = vsel %vm595_vm1, %v597_v14, %v599_v15  ;;  %v578_v26 = vsel %vm575_vm2, %v576_v16, %v577_v17  ;;  %v2847_v49 = vld [vmem:[%s3881_s23 + $0x14] ss:$8 sps:$4 sm:$0xff]   ;;  %v2849_v50 = vld [vmem:[%s3881_s23 + $0x10] ss:$8 sps:$4 sm:$0xff]   ;;  %v2850_v51 = vld [vmem:[%s3881_s23 + $0x4] ss:$8 sps:$4 sm:$0xff]  }
  0x27   : > { %v2742_v27 = vpack.i.bf16 %v600_v25, %v598_v24  ;;  %v580_v28 = vsel %vm575_vm2, %v577_v17, %v579_v20  ;;  %v562_v29 = vsel %vm555_vm0, %v559_v11, %v561_v21  ;;  %v581_v30 = vrot.slane %v3243_v13, 2  ;;  %v2852_v52 = vld [vmem:[%s3881_s23] ss:$8 sps:$4 sm:$0xff]   ;;  %v2853_v53 = vld [vmem:[%s3881_s23 + $0x94] ss:$8 sps:$4 sm:$0xff]   ;;  %s3065_s21 = smov 40  }
  0x28   : > { %2733 = vrot.lane.b32.xlu0 %v2732_v23, %s3057_s19  ;;  %v2737_v32 = vpack.i.bf16 %v580_v28, %v578_v26  ;;  %v601_v33 = vrot.slane %v3243_v13, 3  ;;  %789 = vmatpush1.bf16.msra.mxu0 %v2837_v8  ;;  %v616_v34 = vrot.slane %v3230_v5, 4  ;;  %v2747_v35 = vpack.i.bf16 %v561_v21, %v562_v29  ;;  %v2855_v54 = vld [vmem:[%s3881_s23 + $0x90] ss:$8 sps:$4 sm:$0xff]   ;;  %v2856_v55 = vld [vmem:[%s3881_s23 + $0x84] ss:$8 sps:$4 sm:$0xff]  }
  0x29   : > { %2743 = vrot.lane.b32.xlu1 %v2742_v27, %s3058_s1  ;;  %v582_v36 = vsel %vm575_vm2, %v579_v20, %v581_v30  ;;  %790 = vmatprep.subr.bf16.mxu0 %v2838_v22  ;;  %v617_v38 = vrot.slane %v3232_v6, 4  ;;  %v619_v40 = vrot.slane %v3234_v7, 4  ;;  %v2858_v56 = vld [vmem:[%s3881_s23 + $0x80] ss:$8 sps:$4 sm:$0xff]   ;;  %v621_v58 = vrot.slane %v3243_v13, 4  ;;  %v2859_v28 = vld [vmem:[%s3842_s3 + $0x38] sm:$0xff]  }
  0x2a   : > { %v602_v39 = vsel %vm595_vm1, %v599_v15, %v601_v33  ;;  %v2752_v42 = vpack.i.bf16 %v581_v30, %v582_v36  ;;  %v3060_v29 = vmov 0   ;;  %v2860_v30 = vld [vmem:[%s3842_s3 + $0x30] sm:$0xff]   ;;  %v2866_v36 = vld [vmem:[%s3842_s3] sm:$0xff]   ;;  %vm894_vm7 = vcmask 318464   ;;  %s3066_s22 = smov 84   ;;  %s2586_s27 = sshll.u32 %s3183_s28, 4 }
  0x2b   : > { %v618_v41 = vsel %vm615_vm3, %v616_v34, %v617_v38  ;;  %v620_v44 = vsel %vm615_vm3, %v617_v38, %v619_v40  ;;  %v2757_v45 = vpack.i.bf16 %v601_v33, %v602_v39  ;;  %v622_v1 = vsel %vm615_vm3, %v619_v40, %v621_v58  ;;  %1005 = vmatprep.subr.bf16.mxu1 %v3060_v29  ;;  %v2863_v33 = vld [vmem:[%s3842_s3 + $0x18] sm:$0xff]   ;;  %v2864_v34 = vld [vmem:[%s3842_s3 + $0x10] sm:$0xff]   ;;  %v666_v40 = vld [vmem:[%s3883_s2] sm:$0x3] }
  0x2c   : > { %2738 = vrot.lane.b32.xlu0 %v2737_v32, %s3059_s30  ;;  %791 = vmatpush1.bf16.msra.mxu0 %v2840_v31  ;;  %v643_v47 = vpack.c.bf16 %v620_v44, %v618_v41  ;;  %v645_v15 = vpack.c.bf16 %v621_v58, %v622_v1  ;;  %v2861_v31 = vld [vmem:[%s3842_s3 + $0x28] sm:$0xff]   ;;  %v2862_v32 = vld [vmem:[%s3842_s3 + $0x20] sm:$0xff]   ;;  %vm869_vm8 = vcmask 1039360   ;;  %vm995_vm9 = vcmask 326656  }
  0x2d   : > { %2748 = vrot.lane.b32.xlu1 %v2747_v35, %s3057_s19  ;;  %792 = vmatprep.subr.bf16.mxu0 %v2841_v37  ;;  %v2865_v35 = vld [vmem:[%s3842_s3 + $0x8] sm:$0xff]   ;;  %v668_v37 = vlaneseq  ;;  %vm3064_vm10 = vmmov 0   ;;  %vm1063_vm11 = vcmask 228352   ;;  %vm1552_vm12 = vcmask 1041408  }
  0x2e   : > { %2460 = vmatprep.mubr.msk.bf16.mxu0 %vm627_vm4, %v643_v47  ;;  %2827 = vset.pattern.permute.xlu1 %v3060_v29  ;;  %vm1203_vm13 = vcmask 687104   ;;  %vm1211_vm14 = vcmask 654336   ;;  %vm1548_vm15 = vcmask 293888  }
  0x2f   : > { %1006 = vmatpush1.bf16.msra.mxu1 %v2859_v28  ;;  %2828 = vset.pattern.permute.xlu0 %v3060_v29  ;;  %v3368_v38 = vshrl.u32 %v668_v37, 7 }
  0x30   : > { %2753 = vrot.lane.b32.xlu0 %v2752_v42, %s3059_s30  ;;  %793 = vmatpush1.bf16.msra.mxu0 %v2843_v43  ;;  %v2867_v42 = vld [vmem:[%s3842_s3 + $0x50] ss:$0 sps:$4 sm:$0xff]  }
  0x31   : > { %2758 = vrot.lane.b32.xlu1 %v2757_v45, %s3058_s1  ;;  %794 = vmatprep.subr.bf16.mxu0 %v2844_v46  ;;  %v3371_v39 = vsub.s32 0, %v3368_v38  ;;  %v674_v41 = vsub.s32 1, %v3368_v38  ;;  %v1003_v44 = vsel %vm615_vm3, %v2867_v42, 0  ;;  %s3071_s1 = smov [#allocation2]  }
  0x32   : > { %1007 = vmatprep.subr.bf16.mxu1 %v3060_v29  ;;  %s2999_s16 = sshll.u32 %s3071_s1, 4  ;;  %s3000_s16 = int_to_ptr.vmem [resolvable:$false] %s2999_s16 }
  0x33   : > { %1008 = vmatpush1.bf16.msra.mxu1 %v2860_v30  ;;  %v671_v43 = vrot.slane %v666_v40, %v3371_v39  ;;  %v675_v46 = vrot.slane %v666_v40, %v674_v41  ;;  %s3001_s28 = scalar_lea.vmem %s3000_s16, 32 }
  0x34   : > { %795 = vmatpush1.bf16.msra.mxu0 %v2846_v48  ;;  %1009 = vmatprep.subr.bf16.mxu1 %v3060_v29  ;;  %v2868_v48 = vld [vmem:[%s3842_s3 + $0x48] sm:$0xff]  }
  0x35   : > { %796 = vmatprep.subr.bf16.mxu0 %v2847_v49 }
  0x37   : > { %1010 = vmatpush1.bf16.msra.mxu1 %v2861_v31 }
  0x38   : > { %797 = vmatpush1.bf16.msra.mxu0 %v2849_v50  ;;  %1011 = vmatprep.subr.bf16.mxu1 %v3060_v29 }
  0x39   : > { %798 = vmatprep.subr.bf16.mxu0 %v2850_v51 }
  0x3b   : > { %1012 = vmatpush1.bf16.msra.mxu1 %v2862_v32 }
  0x3c   : > { %799 = vmatpush1.bf16.msra.mxu0 %v2852_v52  ;;  %1013 = vmatprep.subr.bf16.mxu1 %v3060_v29 }
  0x3d   : > { %812 = vmatprep.subr.bf16.mxu0 %v2853_v53 }
  0x3f   : > { %1014 = vmatpush1.bf16.msra.mxu1 %v2863_v33 }
  0x40   : > { %813 = vmatpush2.bf16.msra.mxu0 %v2855_v54  ;;  %1015 = vmatprep.subr.bf16.mxu1 %v3060_v29  ;;  %v2869_v54 = vld [vmem:[%s3842_s3 + $0x40] sm:$0xff]  }
  0x41   : > { %814 = vmatprep.subr.bf16.mxu0 %v2856_v55 }
  0x43   : > { %1016 = vmatpush1.bf16.msra.mxu1 %v2864_v34 }
  0x44   : > { %815 = vmatpush2.bf16.msra.mxu0 %v2858_v56  ;;  %1017 = vmatprep.subr.bf16.mxu1 %v3060_v29 }
  0x47   : > { %1018 = vmatpush1.bf16.msra.mxu1 %v2865_v35 }
  0x48   : > { %1019 = vmatprep.subr.bf16.mxu1 %v3060_v29 }
  0x4b   : > { %1020 = vmatpush1.bf16.msra.mxu1 %v2866_v36 }
  0x4c   : > { %1031 = vmatprep.subr.bf16.mxu1 %v3060_v29 }
  0x4f   : > { %1032 = vmatpush2.bf16.msra.mxu1 %v1003_v44 }
  0x50   : > { %1033 = vmatprep.subr.bf16.mxu1 %v3060_v29 }
  0x53   : > { %1034 = vmatpush2.bf16.msra.mxu1 %v2868_v48 }
  0x54   : > { %1035 = vmatprep.subr.bf16.mxu1 %v3060_v29 }
  0x57   : > { %1036 = vmatpush2.bf16.msra.mxu1 %v2869_v54  ;;  %v3063_v54 = vmov 0.0  }
  0x58   : > { %2631 = vmatprep.subr.bf16.mxu1 %v3063_v54 }
  0x9a   : > { %v2734_v57 = vpop.permute.xlu0 %2733 }
  0x9b   : > { %v2744_v59 = vpop.permute.xlu1 %2743  ;;  %v2736_v60 = vunpack.i.h.bf16 %v2734_v57  ;;  %v2735_v61 = vunpack.i.l.bf16 %v2734_v57 }
  0x9c   : > { %v2746_v62 = vunpack.i.h.bf16 %v2744_v59  ;;  %v2745_v63 = vunpack.i.l.bf16 %v2744_v59 }
  0x9d   : > { %v629_v8 = vsel %vm627_vm4, %v3232_v6, %v2736_v60  ;;  %v628_v9 = vsel %vm627_vm4, %v3230_v5, %v2735_v61 }
  0x9e   : > { %v2739_v0 = vpop.permute.xlu0 %2738 }
  0x9f   : > { %v2741_v2 = vunpack.i.h.bf16 %v2739_v0  ;;  %v2740_v3 = vunpack.i.l.bf16 %v2739_v0  ;;  %v2749_v4 = vpop.permute.xlu1 %2748 }
  0xa0   : > { %v2751_v10 = vunpack.i.h.bf16 %v2749_v4  ;;  %v2750_v11 = vunpack.i.l.bf16 %v2749_v4 }
  0xa1   : > { %v633_v12 = vsel %vm632_vm5, %v628_v9, %v2740_v3  ;;  %v634_v14 = vsel %vm632_vm5, %v629_v8, %v2741_v2 }
  0xa2   : > { %v631_v16 = vsel %vm627_vm4, %v3243_v13, %v2751_v10  ;;  %v630_v17 = vsel %vm627_vm4, %v3234_v7, %v2750_v11  ;;  %v2754_v18 = vpop.permute.xlu0 %2753  ;;  %v638_v19 = vsel %vm637_vm6, %v633_v12, %v2745_v63  ;;  %v639_v6 = vsel %vm637_vm6, %v634_v14, %v2746_v62 }
  0xa3   : > { %v2756_v20 = vunpack.i.h.bf16 %v2754_v18  ;;  %v2755_v5 = vunpack.i.l.bf16 %v2754_v18  ;;  %v2759_v21 = vpop.permute.xlu1 %2758  ;;  %v642_v22 = vpack.c.bf16 %v639_v6, %v638_v19 }
  0xa4   : > { %v2761_v23 = vunpack.i.h.bf16 %v2759_v21  ;;  %v2760_v24 = vunpack.i.l.bf16 %v2759_v21 }
  0xa5   : > { %v636_v25 = vsel %vm632_vm5, %v631_v16, %v2756_v20  ;;  %v635_v26 = vsel %vm632_vm5, %v630_v17, %v2755_v5  ;;  %817 = vmatmul.mubr.bf16.vlgmr.msra.gmra.mxu0 %v642_v22 }
  0xa6   : > { %2461 = vmatprep.mubr.msk.bf16.mxu0 %vm627_vm4, %v645_v15  ;;  %v640_v7 = vsel %vm637_vm6, %v635_v26, %v2760_v24  ;;  %v641_v13 = vsel %vm637_vm6, %v636_v25, %v2761_v23  ;;  %vm1808_vm6 = vcmask 80896  }
  0xa7   : > { %v644_v27 = vpack.c.bf16 %v641_v13, %v640_v7 }
  0xad   : > { %827 = vmatmul.mubr.bf16.gmra.mxu0 %v644_v27 }
 0x165   : > { %v818_v45 = vpop.f32.mrf.mxu0 }
 0x166   : > { %v819_v49 = vadd.f32 %v818_v45, %v671_v43 }
 0x167   : > { %v820_v47 = vpop.f32.mrf.mxu0 }
 0x168   : > { %v821_v51 = vadd.f32 %v820_v47, %v675_v46  ;;  %v837_v55 = vmax.f32 %v819_v49, 0.0 }
 0x169   : > { %v822_v50 = vpop.f32.mrf.mxu0 }
 0x16a   : > { %v823_v52 = vadd.f32 %v822_v50, %v671_v43  ;;  %v838_v59 = vmax.f32 %v821_v51, 0.0 }
 0x16b   : > { %v824_v53 = vpop.f32.mrf.mxu0 }
 0x16c   : > { %v839_v56 = vmax.f32 %v823_v52, 0.0  ;;  %v825_v57 = vadd.f32 %v824_v53, %v675_v46 }
 0x16d   : > { %v828_v58 = vpop.f32.mrf.mxu0 }
 0x16e   : > { %v840_v60 = vmax.f32 %v825_v57, 0.0  ;;  %v2762_v61 = vpack.i.bf16 %v839_v56, %v837_v55  ;;  %v829_v1 = vadd.f32 %v828_v58, %v671_v43 }
 0x16f   : > { %v830_v62 = vpop.f32.mrf.mxu0 }
 0x170   : > { %v2767_v63 = vpack.i.bf16 %v840_v60, %v838_v59  ;;  %2763 = vrot.lane.b32.xlu1 %v2762_v61, %s3061_s29  ;;  %v831_v2 = vadd.f32 %v830_v62, %v675_v46  ;;  %v841_v10 = vmax.f32 %v829_v1, 0.0 }
 0x171   : > { %v832_v0 = vpop.f32.mrf.mxu0 }
 0x172   : > { %v833_v3 = vadd.f32 %v832_v0, %v671_v43  ;;  %2768 = vrot.lane.b32.xlu0 %v2767_v63, %s3062_s18  ;;  %v842_v11 = vmax.f32 %v831_v2, 0.0  ;;  %v2870_v2 = vld [vmem:[%s3843_s4] sm:$0x7f]  }
 0x173   : > { %v834_v4 = vpop.f32.mrf.mxu0 }
 0x174   : > { %v843_v8 = vmax.f32 %v833_v3, 0.0  ;;  %v835_v9 = vadd.f32 %v834_v4, %v675_v46  ;;  %v2871_v3 = vld [vmem:[%s3843_s4 + $0x8] sm:$0x7f]   ;;  %v2872_v4 = vld [vmem:[%s3844_s5 + $0x70] ss:$8 sps:$4 sm:$0xff]  }
 0x176   : > { %v844_v12 = vmax.f32 %v835_v9, 0.0  ;;  %2773 = vrot.lane.b32.xlu0 %v2762_v61, %s3062_s18  ;;  %v2777_v15 = vpack.i.bf16 %v843_v8, %v841_v10  ;;  %v2877_v9 = vld [vmem:[%s3844_s5 + $0x64] ss:$8 sps:$4 sm:$0xff]  }
 0x178   : > { %v2782_v14 = vpack.i.bf16 %v844_v12, %v842_v11 }
 0x17a   : > { %2778 = vrot.lane.b32.xlu0 %v2777_v15, %s3061_s29  ;;  %2783 = vrot.lane.b32.xlu1 %v2782_v14, %s3062_s18  ;;  %v2880_v14 = vld [vmem:[%s3844_s5 + $0x54] ss:$8 sps:$4 sm:$0xff]  }
 0x17e   : > { %2788 = vrot.lane.b32.xlu1 %v2777_v15, %s3062_s18  ;;  %v2895_v15 = vld [vmem:[%s3844_s5 + $0x164] ss:$8 sps:$4 sm:$0xff]  }
 0x1e2   : > { %v2764_v16 = vpop.permute.xlu1 %2763 }
 0x1e3   : > { %v2766_v18 = vunpack.i.h.bf16 %v2764_v16  ;;  %v2765_v19 = vunpack.i.l.bf16 %v2764_v16  ;;  %v2893_v16 = vld [vmem:[%s3844_s5 + $0x160] ss:$8 sps:$4 sm:$0xff]  }
 0x1e4   : > { %v2769_v17 = vpop.permute.xlu0 %2768 }
 0x1e5   : > { %v2771_v6 = vunpack.i.h.bf16 %v2769_v17  ;;  %v2770_v20 = vunpack.i.l.bf16 %v2769_v17  ;;  %v2878_v17 = vld [vmem:[%s3844_s5 + $0x50] ss:$8 sps:$4 sm:$0xff]  }
 0x1e7   : > { %v895_v5 = vsel %vm894_vm7, %v2770_v20, %v2765_v19  ;;  %v896_v21 = vsel %vm894_vm7, %v2771_v6, %v2766_v18  ;;  %v2901_v18 = vld [vmem:[%s3844_s5 + $0x154] ss:$8 sps:$4 sm:$0xff]   ;;  %v2883_v19 = vld [vmem:[%s3844_s5 + $0x44] ss:$8 sps:$4 sm:$0xff]  }
 0x1e8   : > { %v2774_v22 = vpop.permute.xlu0 %2773  ;;  %v900_v23 = vmax.f32 %v838_v59, %v895_v5  ;;  %v902_v24 = vmax.f32 %v840_v60, %v896_v21  ;;  %v2907_v5 = vld [vmem:[%s3844_s5 + $0x144] ss:$8 sps:$4 sm:$0xff]   ;;  %v2886_v21 = vld [vmem:[%s3844_s5 + $0x34] ss:$8 sps:$4 sm:$0xff]  }
 0x1e9   : > { %v2776_v25 = vunpack.i.h.bf16 %v2774_v22  ;;  %v2775_v26 = vunpack.i.l.bf16 %v2774_v22  ;;  %v2905_v22 = vld [vmem:[%s3844_s5 + $0x140] ss:$8 sps:$4 sm:$0xff]  }
 0x1ea   : > { %v908_v7 = vpack.c.bf16 %v902_v24, %v900_v23  ;;  %v2884_v23 = vld [vmem:[%s3844_s5 + $0x30] ss:$8 sps:$4 sm:$0xff]   ;;  %v2913_v24 = vld [vmem:[%s3844_s5 + $0x134] ss:$8 sps:$4 sm:$0xff]  }
 0x1eb   : > { %v871_v13 = vsel %vm869_vm8, %v2776_v25, %v2771_v6  ;;  %v870_v27 = vsel %vm869_vm8, %v2775_v26, %v2770_v20  ;;  %v2899_v6 = vld [vmem:[%s3844_s5 + $0x150] ss:$8 sps:$4 sm:$0xff]   ;;  %v2881_v20 = vld [vmem:[%s3844_s5 + $0x40] ss:$8 sps:$4 sm:$0xff]   ;;  %v2892_v25 = vld [vmem:[%s3844_s5 + $0x24] ss:$8 sps:$4 sm:$0xff]  }
 0x1ec   : > { %v2779_v28 = vpop.permute.xlu0 %2778  ;;  %v2784_v30 = vpop.permute.xlu1 %2783  ;;  %2473 = vmatprep.mubr.msk.bf16.mxu1 %vm995_vm9, %v908_v7  ;;  %v899_v31 = vmax.f32 %v837_v55, %v870_v27  ;;  %v901_v32 = vmax.f32 %v839_v56, %v871_v13  ;;  %v2911_v26 = vld [vmem:[%s3844_s5 + $0x130] ss:$8 sps:$4 sm:$0xff]   ;;  %v2890_v7 = vld [vmem:[%s3844_s5 + $0x20] ss:$8 sps:$4 sm:$0xff]   ;;  %v2919_v13 = vld [vmem:[%s3844_s5 + $0x124] ss:$8 sps:$4 sm:$0xff]  }
 0x1ed   : > { %v2781_v33 = vunpack.i.h.bf16 %v2779_v28  ;;  %v2780_v34 = vunpack.i.l.bf16 %v2779_v28  ;;  %v2786_v35 = vunpack.i.h.bf16 %v2784_v30  ;;  %v2785_v36 = vunpack.i.l.bf16 %v2784_v30  ;;  %v2898_v27 = vld [vmem:[%s3844_s5 + $0x14] ss:$8 sps:$4 sm:$0xff]   ;;  %v2917_v28 = vld [vmem:[%s3844_s5 + $0x120] ss:$8 sps:$4 sm:$0xff]   ;;  %v2896_v30 = vld [vmem:[%s3844_s5 + $0x10] ss:$8 sps:$4 sm:$0xff]  }
 0x1ee   : > { %v907_v37 = vpack.c.bf16 %v901_v32, %v899_v31  ;;  %v2925_v31 = vld [vmem:[%s3844_s5 + $0x114] ss:$8 sps:$4 sm:$0xff]   ;;  %v2904_v32 = vld [vmem:[%s3844_s5 + $0x4] ss:$8 sps:$4 sm:$0xff]  }
 0x1ef   : > { %v898_v40 = vsel %vm894_vm7, %v2786_v35, %v2781_v33  ;;  %v897_v42 = vsel %vm894_vm7, %v2785_v36, %v2780_v34  ;;  %v2923_v33 = vld [vmem:[%s3844_s5 + $0x110] ss:$8 sps:$4 sm:$0xff]   ;;  %v2902_v34 = vld [vmem:[%s3844_s5] ss:$8 sps:$4 sm:$0xff]   ;;  %vm2128_vm7 = vcmask 130048  }
 0x1f0   : > { %v906_v43 = vmax.f32 %v844_v12, %v898_v40  ;;  %v904_v44 = vmax.f32 %v842_v11, %v897_v42  ;;  %v2789_v45 = vpop.permute.xlu1 %2788  ;;  %1038 = vmatmul.mubr.bf16.vlgmr.msra.gmra.mxu1 %v907_v37  ;;  %v2887_v11 = vld [vmem:[%s3844_s5 + $0x170] ss:$8 sps:$4 sm:$0xff]   ;;  %v2889_v12 = vld [vmem:[%s3844_s5 + $0x174] ss:$8 sps:$4 sm:$0xff]   ;;  %v1270_v37 = vld [vmem:[%s3844_s5 + $0x1a0] sm:$0x33] }
 0x1f1   : > { %v2791_v46 = vunpack.i.h.bf16 %v2789_v45  ;;  %v2790_v47 = vunpack.i.l.bf16 %v2789_v45  ;;  %v2929_v40 = vld [vmem:[%s3844_s5 + $0x100] ss:$8 sps:$4 sm:$0xff]   ;;  %v2908_v42 = vld [vmem:[%s3844_s5 + $0xf0] ss:$8 sps:$4 sm:$0xff]   ;;  %v2916_v45 = vld [vmem:[%s3844_s5 + $0xe4] ss:$8 sps:$4 sm:$0xff]  }
 0x1f2   : > { %v910_v48 = vpack.c.bf16 %v906_v43, %v904_v44  ;;  %v2534_v43 = vcombine.high %v1270_v37, %v1270_v37  ;;  %v2533_v44 = vcombine.low %v1270_v37, %v1270_v37 }
 0x1f3   : > { %v872_v49 = vsel %vm869_vm8, %v2790_v47, %v2785_v36  ;;  %v873_v50 = vsel %vm869_vm8, %v2791_v46, %v2786_v35  ;;  %v2931_v35 = vld [vmem:[%s3844_s5 + $0x104] ss:$8 sps:$4 sm:$0xff]   ;;  %v2910_v36 = vld [vmem:[%s3844_s5 + $0xf4] ss:$8 sps:$4 sm:$0xff]   ;;  %v2914_v46 = vld [vmem:[%s3844_s5 + $0xe0] ss:$8 sps:$4 sm:$0xff]  }
 0x1f4   : > { %2474 = vmatprep.mubr.msk.bf16.mxu1 %vm995_vm9, %v910_v48  ;;  %v903_v51 = vmax.f32 %v841_v10, %v872_v49  ;;  %v905_v52 = vmax.f32 %v843_v8, %v873_v50  ;;  %v2874_v8 = vld [vmem:[%s3844_s5 + $0x74] ss:$8 sps:$4 sm:$0xff]   ;;  %v2875_v10 = vld [vmem:[%s3844_s5 + $0x60] ss:$8 sps:$4 sm:$0xff]   ;;  %v1554_v47 = vsel %vm1552_vm12, %v2533_v44, 0 }
 0x1f5   : > { %1559 = vmatprep.subr.bf16.mxu0 %v2874_v8  ;;  %v2922_v48 = vld [vmem:[%s3844_s5 + $0xd4] ss:$8 sps:$4 sm:$0xff]   ;;  %v2920_v49 = vld [vmem:[%s3844_s5 + $0xd0] ss:$8 sps:$4 sm:$0xff]   ;;  %v2928_v50 = vld [vmem:[%s3844_s5 + $0xc4] ss:$8 sps:$4 sm:$0xff]  }
 0x1f6   : > { %v909_v53 = vpack.c.bf16 %v905_v52, %v903_v51  ;;  %1560 = vmatpush1.bf16.msra.mxu0 %v2872_v4  ;;  %v2926_v51 = vld [vmem:[%s3844_s5 + $0xc0] ss:$8 sps:$4 sm:$0xff]   ;;  %v2934_v52 = vld [vmem:[%s3844_s5 + $0xb4] ss:$8 sps:$4 sm:$0xff]   ;;  %v2948_v4 = vld [vmem:[%s3844_s5 + $0x184] ss:$8 sps:$4 sm:$0xff]  }
 0x1f7   : > { %1561 = vmatprep.subr.bf16.mxu0 %v2877_v9  ;;  %v2946_v8 = vld [vmem:[%s3844_s5 + $0x180] ss:$8 sps:$4 sm:$0xff]  }
 0x1f8   : > { %1046 = vmatmul.mubr.bf16.gmra.mxu1 %v909_v53  ;;  %v2932_v53 = vld [vmem:[%s3844_s5 + $0xb0] ss:$8 sps:$4 sm:$0xff]  }
 0x1f9   : > { %2635 = vmatprep.mubr.msk.bf16.mxu1 %vm3064_vm10, %v3063_v54 }
 0x1fa   : > { %1562 = vmatpush1.bf16.msra.mxu0 %v2875_v10  ;;  %v2949_v10 = vld [vmem:[%s3844_s5 + $0x80] ss:$8 sps:$4 sm:$0xff]  }
 0x1fb   : > { %1563 = vmatprep.subr.bf16.mxu0 %v2880_v14 }
 0x1fe   : > { %1564 = vmatpush1.bf16.msra.mxu0 %v2878_v17 }
 0x1ff   : > { %1565 = vmatprep.subr.bf16.mxu0 %v2883_v19 }
 0x202   : > { %1566 = vmatpush1.bf16.msra.mxu0 %v2881_v20 }
 0x203   : > { %1567 = vmatprep.subr.bf16.mxu0 %v2886_v21 }
 0x206   : > { %1568 = vmatpush1.bf16.msra.mxu0 %v2884_v23 }
 0x207   : > { %1569 = vmatprep.subr.bf16.mxu0 %v2892_v25 }
 0x20a   : > { %1570 = vmatpush1.bf16.msra.mxu0 %v2890_v7 }
 0x20b   : > { %1571 = vmatprep.subr.bf16.mxu0 %v2898_v27 }
 0x20e   : > { %1572 = vmatpush1.bf16.msra.mxu0 %v2896_v30 }
 0x20f   : > { %1573 = vmatprep.subr.bf16.mxu0 %v2904_v32 }
 0x212   : > { %1574 = vmatpush1.bf16.msra.mxu0 %v2902_v34 }
 0x213   : > { %1575 = vmatprep.subr.bf16.mxu0 %v2910_v36 }
 0x216   : > { %1576 = vmatpush2.bf16.msra.mxu0 %v2908_v42 }
 0x217   : > { %1577 = vmatprep.subr.bf16.mxu0 %v2916_v45 }
 0x21a   : > { %1578 = vmatpush2.bf16.msra.mxu0 %v2914_v46 }
 0x21b   : > { %1579 = vmatprep.subr.bf16.mxu0 %v2922_v48 }
 0x21e   : > { %1580 = vmatpush2.bf16.msra.mxu0 %v2920_v49 }
 0x21f   : > { %1581 = vmatprep.subr.bf16.mxu0 %v2928_v50 }
 0x222   : > { %1582 = vmatpush2.bf16.msra.mxu0 %v2926_v51 }
 0x223   : > { %1583 = vmatprep.subr.bf16.mxu0 %v2934_v52 }
 0x226   : > { %1584 = vmatpush2.bf16.msra.mxu0 %v2932_v53 }
 0x2b0   : > { %v1039_v55 = vpop.f32.mrf.mxu1 }
 0x2b2   : > { %v1041_v56 = vpop.f32.mrf.mxu1 }
 0x2b3   : > { %v2936_v56 = vld [vmem:[%s3844_s5 + $0xa0] ss:$8 sps:$4 sm:$0xff]  }
 0x2b4   : > { %v1042_v57 = vpop.f32.mrf.mxu1 }
 0x2b5   : > { %v1054_v1 = vpack.c.bf16 %v1042_v57, %v1039_v55  ;;  %v2938_v55 = vld [vmem:[%s3844_s5 + $0xa4] ss:$8 sps:$4 sm:$0xff]  }
 0x2b6   : > { %v1044_v58 = vpop.f32.mrf.mxu1  ;;  %1585 = vmatprep.subr.bf16.mxu0 %v2938_v55 }
 0x2b7   : > { %1586 = vmatpush2.bf16.msra.mxu0 %v2936_v56  ;;  %v2952_v56 = vld [vmem:[%s3846_s7 + $0x38] sm:$0xff]  }
 0x2b8   : > { %v1047_v59 = vpop.f32.mrf.mxu1 }
 0x2ba   : > { %v1049_v60 = vpop.f32.mrf.mxu1 }
 0x2bc   : > { %v1050_v61 = vpop.f32.mrf.mxu1 }
 0x2bd   : > { %v1055_v62 = vpack.c.bf16 %v1050_v61, %v1047_v59  ;;  %v2942_v61 = vld [vmem:[%s3844_s5 + $0x194] ss:$8 sps:$4 sm:$0xff]  }
 0x2be   : > { %v1052_v63 = vpop.f32.mrf.mxu1 }
 0x2bf   : > { %v1068_v0 = vsel %vm575_vm2, %v1055_v62, 0  ;;  %v2940_v62 = vld [vmem:[%s3844_s5 + $0x190] ss:$8 sps:$4 sm:$0xff]   ;;  %v2945_v63 = vld [vmem:[%s3844_s5 + $0x94] ss:$8 sps:$4 sm:$0xff]  }
 0x2c0   : > { %2632 = vmatpush3.bf16.msra.mxu1 %v1068_v0  ;;  %1587 = vmatprep.subr.bf16.mxu0 %v2945_v63  ;;  %v1271_v63 = vld [vmem:[%s3845_s6] sm:$0x3] }
 0x2c1   : > { %2633 = vmatprep.subr.bf16.mxu1 %v3063_v54 }
 0x2c4   : > { %2634 = vmatpush3.bf16.msra.mxu1 %v1054_v1 }
 0x2c5   : > { %2639 = vmatprep.subr.bf16.mxu1 %v3063_v54 }
 0x2c7   : > { %2636 = vmatmul.mubr.msk.bf16.vlgmr.msra.gmra.mxu1 %vm1063_vm11, %v2870_v2 }
 0x2c8   : > { %2640 = vmatpush3.bf16.msra.mxu1 %v1068_v0  ;;  %2643 = vmatprep.mubr.msk.bf16.mxu1 %vm3064_vm10, %v3063_v54 }
 0x2c9   : > { %2641 = vmatprep.subr.bf16.mxu1 %v3063_v54 }
 0x2cc   : > { %2642 = vmatpush3.bf16.msra.mxu1 %v1054_v1  ;;  %v2943_v1 = vld [vmem:[%s3844_s5 + $0x90] ss:$8 sps:$4 sm:$0xff]  }
 0x2cd   : > { %1602 = vmatprep.subr.bf16.mxu1 %v2889_v12  ;;  %1588 = vmatpush2.bf16.msra.mxu0 %v2943_v1 }
 0x2cf   : > { %2644 = vmatmul.mubr.msk.bf16.vlgmr.msra.gmra.mxu1 %vm1063_vm11, %v2871_v3 }
 0x2d0   : > { %1603 = vmatpush1.bf16.msra.mxu1 %v2887_v11  ;;  %v2951_v11 = vld [vmem:[%s3844_s5 + $0x84] ss:$8 sps:$4 sm:$0xff]  }
 0x2d1   : > { %1604 = vmatprep.subr.bf16.mxu1 %v2895_v15  ;;  %1589 = vmatprep.subr.bf16.mxu0 %v2951_v11 }
 0x2d2   : > { %1590 = vmatpush2.bf16.msra.mxu0 %v2949_v10 }
 0x2d3   : > { %2647 = vmatprep.subr.bf16.mxu0 %v3063_v54 }
 0x2d4   : > { %1605 = vmatpush1.bf16.msra.mxu1 %v2893_v16 }
 0x2d5   : > { %1606 = vmatprep.subr.bf16.mxu1 %v2901_v18 }
 0x2d8   : > { %1607 = vmatpush1.bf16.msra.mxu1 %v2899_v6 }
 0x2d9   : > { %1608 = vmatprep.subr.bf16.mxu1 %v2907_v5 }
 0x2dc   : > { %1609 = vmatpush1.bf16.msra.mxu1 %v2905_v22 }
 0x2dd   : > { %1610 = vmatprep.subr.bf16.mxu1 %v2913_v24 }
 0x2e0   : > { %1611 = vmatpush1.bf16.msra.mxu1 %v2911_v26 }
 0x2e1   : > { %1612 = vmatprep.subr.bf16.mxu1 %v2919_v13 }
 0x2e4   : > { %1613 = vmatpush1.bf16.msra.mxu1 %v2917_v28 }
 0x2e5   : > { %1614 = vmatprep.subr.bf16.mxu1 %v2925_v31 }
 0x2e8   : > { %1615 = vmatpush1.bf16.msra.mxu1 %v2923_v33 }
 0x2e9   : > { %1616 = vmatprep.subr.bf16.mxu1 %v2931_v35 }
 0x2ec   : > { %1617 = vmatpush1.bf16.msra.mxu1 %v2929_v40 }
 0x2ed   : > { %2535 = vmatprep.subr.msk.bf16.mxu1 %vm1552_vm12, %v2534_v43 }
 0x2f0   : > { %1629 = vmatpush2.bf16.msra.mxu1 %v1554_v47 }
 0x2f1   : > { %1630 = vmatprep.subr.bf16.mxu1 %v2942_v61  ;;  %v2957_v61 = vld [vmem:[%s3846_s7 + $0x10] sm:$0xff]  }
 0x2f4   : > { %1631 = vmatpush2.bf16.msra.mxu1 %v2940_v62  ;;  %v2958_v62 = vld [vmem:[%s3846_s7 + $0x8] sm:$0xff]  }
 0x2f5   : > { %1632 = vmatprep.subr.bf16.mxu1 %v2948_v4 }
 0x2f8   : > { %1633 = vmatpush2.bf16.msra.mxu1 %v2946_v8  ;;  %v2959_v8 = vld [vmem:[%s3846_s7] sm:$0xff]  }
 0x2f9   : > { %1765 = vmatprep.subr.bf16.mxu1 %v3060_v29 }
 0x387   : > { %v1104_v57 = vpop.f32.mrf.mxu1 }
 0x389   : > { %v2637_v58 = vpop.f32.mrf.mxu1 }
 0x38a   : > { %v2954_v58 = vld [vmem:[%s3846_s7 + $0x28] sm:$0xff]  }
 0x38b   : > { %v1107_v59 = vpop.f32.mrf.mxu1 }
 0x38d   : > { %v2638_v60 = vpop.f32.mrf.mxu1 }
 0x38e   : > { %v2956_v60 = vld [vmem:[%s3846_s7 + $0x18] sm:$0xff]  }
 0x38f   : > { %v1156_v0 = vpop.f32.mrf.mxu1 }
 0x390   : > { %v1163_v2 = vmax.f32 %v1104_v57, %v1156_v0  ;;  %v2953_v57 = vld [vmem:[%s3846_s7 + $0x30] sm:$0xff]   ;;  %v1276_v0 = vrot.slane %v1271_v63, %v3371_v39 }
 0x391   : > { %v2645_v3 = vpop.f32.mrf.mxu1 }
 0x392   : > { %v1176_v15 = vrot.slane %v1163_v2, 2  ;;  %v1167_v16 = vrot.slane %v1163_v2, 1  ;;  %v1194_v21 = vrot.slane %v1163_v2, 4  ;;  %v1185_v22 = vrot.slane %v1163_v2, 3 }
 0x393   : > { %v1159_v9 = vpop.f32.mrf.mxu1 }
 0x394   : > { %v1164_v12 = vmax.f32 %v1107_v59, %v1159_v9  ;;  %v2955_v59 = vld [vmem:[%s3846_s7 + $0x20] sm:$0xff]  }
 0x395   : > { %v2646_v14 = vpop.f32.mrf.mxu1 }
 0x396   : > { %v1177_v17 = vrot.slane %v1164_v12, 2  ;;  %v1168_v18 = vrot.slane %v1164_v12, 1  ;;  %v1195_v19 = vrot.slane %v1164_v12, 4  ;;  %v1186_v6 = vrot.slane %v1164_v12, 3 }
 0x398   : > { %v1178_v20 = vsel %vm575_vm2, %v1176_v15, %v1177_v17  ;;  %v1169_v5 = vsel %vm555_vm0, %v1167_v16, %v1168_v18  ;;  %v1196_v25 = vsel %vm615_vm3, %v1194_v21, %v1195_v19  ;;  %v1187_v26 = vsel %vm595_vm1, %v1185_v22, %v1186_v6  ;;  %v2960_v15 = vld [vmem:[%s3846_s7 + $0x48] sm:$0xff]  }
 0x399   : > { %v2797_v23 = vpack.i.bf16 %v1177_v17, %v1178_v20  ;;  %v2792_v24 = vpack.i.bf16 %v1168_v18, %v1169_v5  ;;  %v2807_v7 = vpack.i.bf16 %v1195_v19, %v1196_v25  ;;  %v2802_v13 = vpack.i.bf16 %v1186_v6, %v1187_v26  ;;  %v2961_v20 = vld [vmem:[%s3846_s7 + $0x40] sm:$0xff]  }
 0x39a   : > { %vm1208_vm0 = vcmask 1014784   ;;  %vm1673_vm2 = vcmask 252928  }
 0x39b   : > { %2798 = vrot.lane.b32.xlu1 %v2797_v23, %s3065_s21  ;;  %2793 = vrot.lane.b32.xlu0 %v2792_v24, %s3066_s22  ;;  %s3070_s21 = smov 112   ;;  %s539_s22 = sand.u32 1, %s3047_s25  }
 0x39c   : > { %s540_s0 = scalar_lea.vmem [#allocation2], %s539_s22 }
 0x39d   : > { %s2379_s20 = sshll.u32 %s540_s0, 4  ;;  %s2380_s20 = int_to_ptr.vmem [resolvable:$true] %s2379_s20 }
 0x39e   : > { %p3002_p0 = scmp.lt.s32.totalorder %s2380_s20, %s3000_s16 }
 0x39f   : > { %2808 = vrot.lane.b32.xlu1 %v2807_v7, %s3067_s24  ;;  %2803 = vrot.lane.b32.xlu0 %v2802_v13, %s3068_s26  ;;  %s3886_s26 = sld [smem:[#allocation16_spill]] }
 0x3a5   : > { %s2377_s2 = scalar_lea.hbm %s3886_s26, %s2586_s27 }
 0x40d   : > { %v2799_v27 = vpop.permute.xlu1 %2798  ;;  %v2794_v28 = vpop.permute.xlu0 %2793 }
 0x40e   : > { %v2801_v30 = vunpack.i.h.bf16 %v2799_v27  ;;  %v2800_v31 = vunpack.i.l.bf16 %v2799_v27  ;;  %v2796_v32 = vunpack.i.h.bf16 %v2794_v28  ;;  %v2795_v33 = vunpack.i.l.bf16 %v2794_v28 }
 0x410   : > { %v1205_v43 = vsel %vm1203_vm13, %v1164_v12, %v2796_v32  ;;  %v1207_v44 = vsel %vm995_vm9, %v2796_v32, %v2801_v30  ;;  %v1204_v45 = vsel %vm1203_vm13, %v1163_v2, %v2795_v33  ;;  %v1206_v46 = vsel %vm995_vm9, %v2795_v33, %v2800_v31 }
 0x411   : > { %v2809_v34 = vpop.permute.xlu1 %2808  ;;  %v2804_v35 = vpop.permute.xlu0 %2803  ;;  %v1214_v55 = vpack.c.bf16 %v1205_v43, %v1204_v45  ;;  %v1280_v2 = vrot.slane %v1271_v63, %v674_v41  ;;  %v2969_v63 = vld [vmem:[%s3848_s9 + $0x68] sm:$0xff]  }
 0x412   : > { %v2811_v36 = vunpack.i.h.bf16 %v2809_v34  ;;  %v2810_v37 = vunpack.i.l.bf16 %v2809_v34  ;;  %v2806_v40 = vunpack.i.h.bf16 %v2804_v35  ;;  %v2805_v42 = vunpack.i.l.bf16 %v2804_v35 }
 0x414   : > { %v1217_v47 = vpack.c.bf16 %v2811_v36, %v2810_v37  ;;  %v1213_v48 = vsel %vm1211_vm14, %v2806_v40, %v2811_v36  ;;  %v1212_v49 = vsel %vm1211_vm14, %v2805_v42, %v2810_v37  ;;  %v1209_v50 = vsel %vm1208_vm0, %v1206_v46, %v2805_v42 }
 0x415   : > { %v1216_v51 = vpack.c.bf16 %v1213_v48, %v1212_v49  ;;  %v1210_v52 = vsel %vm1208_vm0, %v1207_v44, %v2806_v40 }
 0x416   : > { %2536 = vmatprep.mubr.msk.bf16.mxu1 %vm1548_vm15, %v1217_v47  ;;  %v1215_v53 = vpack.c.bf16 %v1210_v52, %v1209_v50 }
 0x417   : > { %1635 = vmatmul.mubr.bf16.vlgmr.msra.gmra.mxu1 %v1216_v51 }
 0x418   : > { %1591 = vmatprep.mubr.bf16.mxu0 %v1215_v53  ;;  %1766 = vmatpush1.bf16.msra.mxu1 %v2952_v56  ;;  %v2549_v56 = vld [vmem:[%s3847_s8 + $0x4] sm:$0x7] }
 0x419   : > { %1592 = vmatmul.mubr.bf16.vlgmr.msra.gmra.mxu0 %v1214_v55  ;;  %1767 = vmatprep.subr.bf16.mxu1 %v3060_v29  ;;  %v1807_v55 = vld [vmem:[%s3847_s8] sm:$0x7] }
 0x41a   : > { %2649 = vmatprep.mubr.msk.bf16.mxu0 %vm3064_vm10, %v3063_v54 }
 0x41c   : > { %1768 = vmatpush1.bf16.msra.mxu1 %v2953_v57  ;;  %v2962_v57 = vld [vmem:[%s3848_s9 + $0xb8] sm:$0xff]  }
 0x41d   : > { %1769 = vmatprep.subr.bf16.mxu1 %v3060_v29 }
 0x420   : > { %1770 = vmatpush1.bf16.msra.mxu1 %v2954_v58  ;;  %v2963_v58 = vld [vmem:[%s3848_s9 + $0x78] sm:$0xff]  }
 0x421   : > { %1771 = vmatprep.subr.bf16.mxu1 %v3060_v29 }
 0x424   : > { %1772 = vmatpush1.bf16.msra.mxu1 %v2955_v59  ;;  %v2965_v59 = vld [vmem:[%s3848_s9 + $0x38] sm:$0xff]  }
 0x425   : > { %1773 = vmatprep.subr.bf16.mxu1 %v3060_v29 }
 0x428   : > { %1774 = vmatpush1.bf16.msra.mxu1 %v2956_v60  ;;  %v2966_v60 = vld [vmem:[%s3848_s9 + $0x70] sm:$0xff]  }
 0x429   : > { %1775 = vmatprep.subr.bf16.mxu1 %v3060_v29 }
 0x42c   : > { %1776 = vmatpush1.bf16.msra.mxu1 %v2957_v61  ;;  %v2964_v61 = vld [vmem:[%s3848_s9 + $0xb0] sm:$0xff]  }
 0x42d   : > { %1777 = vmatprep.subr.bf16.mxu1 %v3060_v29 }
 0x430   : > { %1778 = vmatpush1.bf16.msra.mxu1 %v2958_v62  ;;  %v2968_v62 = vld [vmem:[%s3848_s9 + $0x30] sm:$0xff]  }
 0x431   : > { %1779 = vmatprep.subr.bf16.mxu1 %v3060_v29 }
 0x434   : > { %1780 = vmatpush1.bf16.msra.mxu1 %v2959_v8  ;;  %v2975_v8 = vld [vmem:[%s3848_s9 + $0x58] sm:$0xff]  }
 0x435   : > { %1793 = vmatprep.subr.bf16.mxu1 %v3060_v29 }
 0x438   : > { %1794 = vmatpush2.bf16.msra.mxu1 %v2960_v15  ;;  %v2979_v15 = vld [vmem:[%s3848_s9 + $0x88] sm:$0xff]  }
 0x439   : > { %1795 = vmatprep.subr.bf16.mxu1 %v3060_v29 }
 0x43c   : > { %1796 = vmatpush2.bf16.msra.mxu1 %v2961_v20  ;;  %v2986_v20 = vld [vmem:[%s3848_s9] sm:$0xff]  }
 0x43d   : > { %2172 = vmatprep.subr.bf16.mxu1 %v3060_v29 }
 0x4d7   : > { %v1636_v1 = vpop.f32.mrf.mxu1 }
 0x4d9   : > { %v1593_v3 = vpop.f32.mrf.mxu0  ;;  %v1638_v4 = vpop.f32.mrf.mxu1 }
 0x4da   : > { %v1594_v9 = vadd.f32 %v1593_v3, %v1276_v0  ;;  %v2970_v3 = vld [vmem:[%s3848_s9 + $0xa0] sm:$0xff]  }
 0x4db   : > { %v1595_v10 = vpop.f32.mrf.mxu0  ;;  %v1640_v12 = vpop.f32.mrf.mxu1 }
 0x4dc   : > { %v1596_v11 = vadd.f32 %v1595_v10, %v1280_v2  ;;  %v1637_v38 = vadd.f32 %v1636_v1, %v1594_v9  ;;  %v2971_v1 = vld [vmem:[%s3848_s9 + $0x28] sm:$0xff]   ;;  %v2973_v9 = vld [vmem:[%s3848_s9 + $0x98] sm:$0xff]  }
 0x4dd   : > { %v1597_v14 = vpop.f32.mrf.mxu0  ;;  %v1642_v6 = vpop.f32.mrf.mxu1  ;;  %v2977_v10 = vld [vmem:[%s3848_s9 + $0x18] sm:$0xff]  }
 0x4de   : > { %v1598_v41 = vadd.f32 %v1597_v14, %v1276_v0  ;;  %v1639_v17 = vadd.f32 %v1638_v4, %v1596_v11  ;;  %v1645_v5 = vmax.f32 %v1637_v38, 0.0  ;;  %v2967_v0 = vld [vmem:[%s3848_s9 + $0xa8] sm:$0xff]   ;;  %v2974_v4 = vld [vmem:[%s3848_s9 + $0x20] sm:$0xff]   ;;  %v2978_v11 = vld [vmem:[%s3848_s9 + $0x50] sm:$0xff]  }
 0x4df   : > { %v1599_v16 = vpop.f32.mrf.mxu0  ;;  %v2980_v14 = vld [vmem:[%s3848_s9 + $0x10] sm:$0xff]   ;;  %v2981_v38 = vld [vmem:[%s3848_s9 + $0x48] sm:$0xff]  }
 0x4e0   : > { %v1641_v18 = vadd.f32 %v1640_v12, %v1598_v41  ;;  %v1600_v19 = vadd.f32 %v1599_v16, %v1280_v2  ;;  %v1646_v23 = vmax.f32 %v1639_v17, 0.0  ;;  %v2972_v2 = vld [vmem:[%s3848_s9 + $0x60] sm:$0xff]   ;;  %v2976_v12 = vld [vmem:[%s3848_s9 + $0x90] sm:$0xff]   ;;  %v2983_v16 = vld [vmem:[%s3848_s9 + $0x8] sm:$0xff]  }
 0x4e1   : > { %v2982_v41 = vld [vmem:[%s3848_s9 + $0x80] sm:$0xff]  }
 0x4e2   : > { %v1647_v21 = vmax.f32 %v1641_v18, 0.0  ;;  %v1643_v22 = vadd.f32 %v1642_v6, %v1600_v19  ;;  %v2984_v19 = vld [vmem:[%s3848_s9 + $0x40] sm:$0xff]  }
 0x4e3   : > { %v2985_v6 = vld [vmem:[%s3848_s9 + $0xc0] sm:$0xff]  }
 0x4e4   : > { %v1648_v24 = vmax.f32 %v1643_v22, 0.0  ;;  %v2812_v25 = vpack.i.bf16 %v1647_v21, %v1645_v5 }
 0x4e6   : > { %2813 = vrot.lane.b32.xlu1 %v2812_v25, %s3069_s17  ;;  %v2817_v26 = vpack.i.bf16 %v1648_v24, %v1646_v23  ;;  %s3885_s17 = sld [smem:[#allocation15_spill]] }
 0x4e8   : > { %2818 = vrot.lane.b32.xlu0 %v2817_v26, %s3062_s18 }
 0x4ec   : > { %2823 = vrot.lane.b32.xlu0 %v2812_v25, %s3062_s18 }
 0x558   : > { %v2814_v7 = vpop.permute.xlu1 %2813 }
 0x559   : > { %v2816_v27 = vunpack.i.h.bf16 %v2814_v7  ;;  %v2815_v28 = vunpack.i.l.bf16 %v2814_v7 }
 0x55a   : > { %v2819_v13 = vpop.permute.xlu0 %2818 }
 0x55b   : > { %v2821_v30 = vunpack.i.h.bf16 %v2819_v13  ;;  %v2820_v31 = vunpack.i.l.bf16 %v2819_v13 }
 0x55d   : > { %v1674_v32 = vsel %vm1673_vm2, %v2820_v31, %v2815_v28  ;;  %v1675_v33 = vsel %vm1673_vm2, %v2821_v30, %v2816_v27 }
 0x55e   : > { %v1677_v34 = vmax.f32 %v1646_v23, %v1674_v32  ;;  %v1679_v35 = vmax.f32 %v1648_v24, %v1675_v33  ;;  %v2824_v36 = vpop.permute.xlu0 %2823 }
 0x55f   : > { %v2826_v37 = vunpack.i.h.bf16 %v2824_v36  ;;  %v2825_v40 = vunpack.i.l.bf16 %v2824_v36 }
 0x560   : > { %v1681_v42 = vpack.c.bf16 %v1679_v35, %v1677_v34 }
 0x561   : > { %v1662_v43 = vsel %vm869_vm8, %v2826_v37, %v2821_v30  ;;  %v1661_v44 = vsel %vm869_vm8, %v2825_v40, %v2820_v31  ;;  %v2987_v31 = vld [vmem:[%s3850_s11 + $0x38] ss:$0 sps:$4 sm:$0xff]  }
 0x562   : > { %v1678_v45 = vmax.f32 %v1647_v21, %v1662_v43  ;;  %v1676_v46 = vmax.f32 %v1645_v5, %v1661_v44  ;;  %2547 = vmatprep.mubr.msk.bf16.mxu1 %vm627_vm4, %v1681_v42 }
 0x564   : > { %v1680_v47 = vpack.c.bf16 %v1678_v45, %v1676_v46  ;;  %v2280_v45 = vsel %vm615_vm3, %v2987_v31, 0  ;;  %v2988_v46 = vld [vmem:[%s3850_s11 + $0x30] sm:$0xff]   ;;  %vm2275_vm3 = vcmask 982016  }
 0x566   : > { %1798 = vmatmul.mubr.bf16.vlgmr.msra.gmra.mxu1 %v1680_v47  ;;  %v2989_v47 = vld [vmem:[%s3850_s11 + $0x28] sm:$0xff]  }
 0x567   : > { %2173 = vmatpush1.bf16.msra.mxu1 %v2962_v57  ;;  %v1977_v57 = vld [vmem:[%s3849_s10] sm:$0x1] }
 0x568   : > { %2174 = vmatprep.subr.bf16.mxu1 %v3060_v29 }
 0x56b   : > { %2175 = vmatpush1.bf16.msra.mxu1 %v2964_v61 }
 0x56c   : > { %2176 = vmatprep.subr.bf16.mxu1 %v3060_v29 }
 0x56f   : > { %2177 = vmatpush1.bf16.msra.mxu1 %v2967_v0 }
 0x570   : > { %2178 = vmatprep.subr.bf16.mxu1 %v3060_v29 }
 0x573   : > { %2179 = vmatpush1.bf16.msra.mxu1 %v2970_v3  ;;  %v2229_v3 = vld [vmem:[%s3851_s12] sm:$0x1] }
 0x574   : > { %2180 = vmatprep.subr.bf16.mxu1 %v3060_v29 }
 0x577   : > { %2181 = vmatpush1.bf16.msra.mxu1 %v2973_v9 }
 0x578   : > { %2182 = vmatprep.subr.bf16.mxu1 %v3060_v29 }
 0x57b   : > { %2183 = vmatpush1.bf16.msra.mxu1 %v2976_v12 }
 0x57c   : > { %2184 = vmatprep.subr.bf16.mxu1 %v3060_v29 }
 0x57f   : > { %2185 = vmatpush1.bf16.msra.mxu1 %v2979_v15 }
 0x580   : > { %2186 = vmatprep.subr.bf16.mxu1 %v3060_v29 }
 0x583   : > { %2187 = vmatpush1.bf16.msra.mxu1 %v2982_v41 }
 0x584   : > { %2202 = vmatprep.subr.bf16.mxu1 %v3060_v29 }
 0x587   : > { %2203 = vmatpush2.bf16.msra.mxu1 %v2985_v6 }
 0x626   : > { %v1799_v48 = vpop.f32.mrf.mxu1 }
 0x628   : > { %v1801_v49 = vpop.f32.mrf.mxu1 }
 0x629   : > { %v2991_v49 = vld [vmem:[%s3850_s11 + $0x18] sm:$0xff]  }
 0x62a   : > { %v1802_v50 = vpop.f32.mrf.mxu1 }
 0x62b   : > { %v1806_v51 = vpack.c.bf16 %v1802_v50, %v1799_v48  ;;  %v2990_v48 = vld [vmem:[%s3850_s11 + $0x20] sm:$0xff]   ;;  %v2992_v50 = vld [vmem:[%s3850_s11 + $0x10] sm:$0xff]  }
 0x62c   : > { %v1804_v52 = vpop.f32.mrf.mxu1 }
 0x62d   : > { %v1813_v53 = vsel %vm595_vm1, %v1806_v51, 0  ;;  %vm1920_vm1 = vcmask 916480   ;;  %v2993_v51 = vld [vmem:[%s3850_s11 + $0x8] sm:$0xff]   ;;  %v2994_v52 = vld [vmem:[%s3850_s11] sm:$0xff]  }
 0x62e   : > { %2648 = vmatpush3.bf16.msra.mxu0 %v1813_v53 }
 0x62f   : > { %2653 = vmatprep.subr.bf16.mxu0 %v3063_v54 }
 0x631   : > { %2650 = vmatmul.mubr.msk.bf16.vlgmr.msra.gmra.mxu0 %vm1808_vm6, %v1807_v55 }
 0x632   : > { %2654 = vmatpush3.bf16.msra.mxu0 %v1813_v53  ;;  %2655 = vmatprep.mubr.msk.bf16.mxu0 %vm3064_vm10, %v3063_v54 }
 0x633   : > { %2600 = vmatprep.subr.bf16.mxu0 %v2963_v58 }
 0x639   : > { %2656 = vmatmul.mubr.msk.bf16.vlgmr.msra.gmra.mxu0 %vm1808_vm6, %v2549_v56 }
 0x63a   : > { %2601 = vmatpush3.bf16.msra.mxu0 %v2965_v59 }
 0x63b   : > { %2602 = vmatprep.subr.bf16.mxu0 %v2966_v60 }
 0x63e   : > { %2603 = vmatpush3.bf16.msra.mxu0 %v2968_v62 }
 0x63f   : > { %2604 = vmatprep.subr.bf16.mxu0 %v2969_v63 }
 0x642   : > { %2605 = vmatpush3.bf16.msra.mxu0 %v2971_v1 }
 0x643   : > { %2606 = vmatprep.subr.bf16.mxu0 %v2972_v2 }
 0x646   : > { %2607 = vmatpush3.bf16.msra.mxu0 %v2974_v4 }
 0x647   : > { %2608 = vmatprep.subr.bf16.mxu0 %v2975_v8 }
 0x64a   : > { %2609 = vmatpush3.bf16.msra.mxu0 %v2977_v10  ;;  %v2331_v10 = vld [vmem:[%s3852_s13 + $0x1] sm:$0x1] }
 0x64b   : > { %2610 = vmatprep.subr.bf16.mxu0 %v2978_v11  ;;  %v2323_v11 = vld [vmem:[%s3852_s13] sm:$0x1] }
 0x64e   : > { %2611 = vmatpush3.bf16.msra.mxu0 %v2980_v14 }
 0x64f   : > { %2612 = vmatprep.subr.bf16.mxu0 %v2981_v38 }
 0x652   : > { %2613 = vmatpush3.bf16.msra.mxu0 %v2983_v16 }
 0x653   : > { %2614 = vmatprep.subr.bf16.mxu0 %v2984_v19 }
 0x656   : > { %2615 = vmatpush3.bf16.msra.mxu0 %v2986_v20 }
 0x657   : > { %2659 = vmatprep.subr.bf16.mxu0 %v3063_v54 }
 0x6f1   : > { %v1849_v17 = vpop.f32.mrf.mxu0 }
 0x6f3   : > { %v2651_v18 = vpop.f32.mrf.mxu0 }
 0x6f4   : > { %v2329_v18 = vld [vmem:[%s3853_s14] sm:$0x1] }
 0x6f5   : > { %v1852_v5 = vpop.f32.mrf.mxu0  ;;  %v2340_v19 = vrot.slane %v2329_v18, %v3371_v39  ;;  %v2354_v39 = vld [vmem:[%s3854_s15 + $0x1] sm:$0x1] }
 0x6f7   : > { %v2652_v21 = vpop.f32.mrf.mxu0 }
 0x6f9   : > { %v1894_v29 = vpop.f32.mrf.mxu0 }
 0x6fa   : > { %v1900_v22 = vmax.f32 %v1849_v17, %v1894_v29 }
 0x6fb   : > { %v2657_v23 = vpop.f32.mrf.mxu0 }
 0x6fc   : > { %v1906_v24 = vrot.slane %v1900_v22, 2  ;;  %v1902_v25 = vrot.slane %v1900_v22, 1  ;;  %v1914_v13 = vrot.slane %v1900_v22, 4  ;;  %v1910_v27 = vrot.slane %v1900_v22, 3 }
 0x6fd   : > { %v1897_v26 = vpop.f32.mrf.mxu0 }
 0x6fe   : > { %1907 = vrot.lane.b32.xlu0 %v1906_v24, %s3057_s19  ;;  %1903 = vrot.lane.b32.xlu1 %v1902_v25, %s3067_s24  ;;  %v2347_v25 = vld [vmem:[%s3854_s15] sm:$0x1]  ;;  %s3887_s19 = smov %s3886_s26  ;;  %s2995_s24 = scalar_lea.vmem %s2380_s20, 16 }
 0x6ff   : > { %v2658_v7 = vpop.f32.mrf.mxu0  ;;  %p2996_p11 = scmp.ne.s32.totalorder %s2380_s20, %s2995_s24  ;;  %p3003_p1 = scmp.lt.s32.totalorder %s3001_s28, %s2995_s24 }
 0x701   : > { %p2997_p12 = pnand %p2996_p11, %p3200_p5  ;;  %p3004_p2 = por %p3003_p1, %p3002_p0 }
 0x702   : > { %1915 = vrot.lane.b32.xlu0 %v1914_v13, %s3059_s30  ;;  %1911 = vrot.lane.b32.xlu1 %v1910_v27, %s3070_s21  ;;  %v2362_v27 = vld [vmem:[%s3885_s17] sm:$0x1]  ;;  %s2367_s30 = scalar_lea.sflag [#allocation3], %s539_s22 }
 0x703   : > { %p2998_p13 = pneg %p2997_p12 }
 0x705   : > { %p3005_p3 = pnand %p3004_p2, %p2998_p13 }
 0x770   : > { %v1908_v28 = vpop.permute.xlu0 %1907  ;;  %v1904_v30 = vpop.permute.xlu1 %1903 }
 0x771   : > { %v1918_v32 = vsel %vm1211_vm14, %v1900_v22, %v1904_v30  ;;  %v1919_v33 = vsel %vm627_vm4, %v1904_v30, %v1908_v28  ;;  %vm2325_vm4 = vcmask 679936  }
 0x772   : > { %v1923_v44 = vpack.c.bf16 %v1918_v32, %v1918_v32 }
 0x774   : > { %v1916_v34 = vpop.permute.xlu0 %1915  ;;  %v1912_v35 = vpop.permute.xlu1 %1911 }
 0x775   : > { %v1926_v36 = vpack.c.bf16 %v1916_v34, %v1916_v34  ;;  %v1921_v37 = vsel %vm1920_vm1, %v1919_v33, %v1912_v35  ;;  %v1922_v40 = vsel %vm632_vm5, %v1912_v35, %v1916_v34  ;;  %vm2364_vm5 = vcmask 73728  }
 0x776   : > { %v1924_v42 = vpack.c.bf16 %v1921_v37, %v1921_v37  ;;  %v1925_v43 = vpack.c.bf16 %v1922_v40, %v1922_v40 }
 0x777   : > { %2576 = vmatprep.mubr.msk.bf16.mxu1 %vm2128_vm7, %v1926_v36 }
 0x778   : > { %2164 = vmatprep.mubr.bf16.mxu0 %v1924_v42  ;;  %2205 = vmatmul.mubr.bf16.vlgmr.msra.gmra.mxu1 %v1925_v43 }
 0x779   : > { %2165 = vmatmul.mubr.bf16.vlgmr.msra.gmra.mxu0 %v1923_v44 }
 0x77a   : > { %2660 = vmatpush3.bf16.msra.mxu0 %v2280_v45  ;;  %2675 = vmatprep.mubr.msk.bf16.mxu0 %vm3064_vm10, %v3063_v54 }
 0x77b   : > { %2661 = vmatprep.subr.bf16.mxu0 %v3063_v54 }
 0x77e   : > { %2662 = vmatpush3.bf16.msra.mxu0 %v2988_v46 }
 0x77f   : > { %2663 = vmatprep.subr.bf16.mxu0 %v3063_v54 }
 0x782   : > { %2664 = vmatpush3.bf16.msra.mxu0 %v2989_v47 }
 0x783   : > { %2665 = vmatprep.subr.bf16.mxu0 %v3063_v54 }
 0x786   : > { %2666 = vmatpush3.bf16.msra.mxu0 %v2990_v48 }
 0x787   : > { %2667 = vmatprep.subr.bf16.mxu0 %v3063_v54 }
 0x78a   : > { %2668 = vmatpush3.bf16.msra.mxu0 %v2991_v49 }
 0x78b   : > { %2669 = vmatprep.subr.bf16.mxu0 %v3063_v54 }
 0x78e   : > { %2670 = vmatpush3.bf16.msra.mxu0 %v2992_v50 }
 0x78f   : > { %2671 = vmatprep.subr.bf16.mxu0 %v3063_v54 }
 0x792   : > { %2672 = vmatpush3.bf16.msra.mxu0 %v2993_v51 }
 0x793   : > { %2673 = vmatprep.subr.bf16.mxu0 %v3063_v54 }
 0x796   : > { %2674 = vmatpush3.bf16.msra.mxu0 %v2994_v52 }
 0x838   : > { %v2206_v53 = vpop.f32.mrf.mxu1 }
 0x839   : > { %v2616_v55 = vpop.f32.mrf.mxu0 }
 0x83a   : > { %v2208_v56 = vpop.f32.mrf.mxu1 }
 0x83b   : > { %v2617_v58 = vpop.f32.mrf.mxu0 }
 0x83c   : > { %v2618_v59 = vadd.f32 %v2617_v58, %v2616_v55  ;;  %v2209_v60 = vpop.f32.mrf.mxu1 }
 0x83d   : > { %v2619_v61 = vpop.f32.mrf.mxu0 }
 0x83e   : > { %v2167_v62 = vadd.f32 %v2618_v59, %v1977_v57  ;;  %v2210_v63 = vpop.f32.mrf.mxu1 }
 0x83f   : > { %v2620_v0 = vpop.f32.mrf.mxu0 }
 0x840   : > { %v2207_v54 = vadd.f32 %v2206_v53, %v2167_v62 }
 0x842   : > { %v2212_v1 = vmax.f32 %v2207_v54, 0.0 }
 0x844   : > { %v2213_v2 = vpack.c.bf16 %v2212_v1, %v2212_v1 }
 0x846   : > { %2676 = vmatmul.mubr.msk.bf16.vlgmr.msra.gmra.mxu0 %vm2275_vm3, %v2213_v2 }
 0x906   : > { %v2316_v4 = vpop.f32.mrf.mxu0 }
 0x907   : > { %v2317_v8 = vadd.f32 %v2316_v4, %v2229_v3 }
 0x908   : > { %v2677_v9 = vpop.f32.mrf.mxu0 }
 0x909   : > { %v2322_v12 = vmax.f32 %v2317_v8, 0.0 }
 0x90a   : > { %v2319_v14 = vpop.f32.mrf.mxu0 }
 0x90b   : > { %v2332_v15 = vmul.f32 %v2331_v10, %v2322_v12  ;;  %v2324_v38 = vmul.f32 %v2323_v11, %v2322_v12 }
 0x90c   : > { %v2678_v41 = vpop.f32.mrf.mxu0 }
 0x90d   : > { %v2333_v16 = vsel %vm2325_vm4, %v2332_v15, 0.0  ;;  %v2326_v17 = vsel %vm2325_vm4, %v2324_v38, 0.0 }
 0x90e   : > { %2334 = vadd.xlane.f32.xlu0 %v2333_v16  ;;  %2327 = vadd.xlane.f32.xlu1 %v2326_v17 }
 0x924   : > { %2341 = vrot.lane.b32.xlu0 %v2340_v19, %s3062_s18 }
 0x997   : > { %v2335_v6 = vpop.xlane.xlu0 %2334  ;;  %v2328_v20 = vpop.xlane.xlu1 %2327 }
 0x998   : > { %v2330_v5 = vadd.f32 %v2329_v18, %v2328_v20 }
 0x99a   : > { %v2345_v21 = vmax.f32 %v2330_v5, 0.0 }
 0x99b   : > { %v2342_v29 = vpop.permute.xlu0 %2341 }
 0x99c   : > { %v2344_v22 = vadd.f32 %v2342_v29, %v2335_v6  ;;  %2350 = vperm.xlu1 %2827, %v2345_v21  }
 0x99e   : > { %v2346_v23 = vmax.f32 %v2344_v22, 0.0 }
 0x9a0   : > { %2357 = vperm.xlu1 %2827, %v2346_v23  }
 0xa17   : > { %v2351_v24 = vpop.permute.xlu1 %2350 }
 0xa18   : > { %v2353_v7 = vmul.f32 %v2351_v24, %v2347_v25 }
 0xa1b   : > { %v2358_v26 = vpop.permute.xlu1 %2357 }
 0xa1c   : > { %v2360_v13 = vmul.f32 %v2358_v26, %v2354_v39 }
 0xa1e   : > { %v2361_v28 = vadd.f32 %v2360_v13, %v2353_v7 }
 0xa20   : > { %v2363_v30 = vadd.f32 %v2362_v27, %v2361_v28 }
 0xa22   : > { %2365 = vst.msk [vmem:[%s540_s0] sm:$0x1] %vm2364_vm5, %v2363_v30 }
 0xa23   : > { %3008 = shalt.err (!%p3005_p3)
}
 0xa24   : > { %s3009_s17 = scalar_lea.hbm %s2377_s2, 16  ;;  %s3013_s0 = scalar_lea.hbm %s3887_s19, 32 }
 0xa25   : > { %p3010_p4 = scmp.ne.s32.totalorder %s2377_s2, %s3009_s17  ;;  %p3014_p9 = scmp.lt.s32.totalorder %s2377_s2, %s3887_s19 }
 0xa26   : > { %p3015_p10 = scmp.lt.s32.totalorder %s3013_s0, %s3009_s17 }
 0xa27   : > { %p3011_p7 = pnand %p3010_p4, %p3200_p5 }
 0xa28   : > { %p3016_p11 = por %p3015_p10, %p3014_p9 }
 0xa29   : > { %p3012_p8 = pneg %p3011_p7 }
 0xa2b   : > { %p3017_p12 = pnand %p3016_p11, %p3012_p8 }
 0xa2d   : > { %3020 = shalt.err (!%p3017_p12)
}
 0xa2e   : > { %2679 = dma.vmem_to_hbm [thread:$0]  (%p3200_p5), %s2380_s20, 16, %s2377_s2, %s2367_s30  }
 0xa2f PF: > { %s3888_s26 = sld [smem:[#allocation7_spill]] }
 0xa30   : > { %s3889_s24 = sld [smem:[#allocation5_spill]] }
 0xa35   : > { %p2685_p13 = scmp.ge.s32.totalorder %s3888_s26, 2 }
 0xa36   : > { %s2391_s16 = sand.u32 1, %s3889_s24  }
 0xa37   : > { %p2682_p0 = pnand %p2685_p13, %p3204_p6  ;;  %s2392_s28 = scalar_lea.sflag [#allocation3], %s2391_s16 }
 0xa39   : > { %p2683_p1 = pneg %p2682_p0 }
 0xa3b   : > { %3038 = dma.done.wait (%p2683_p1), %s2392_s28, 16  }
 0xa3c   : > { %3040 = vsyncadd (%p2683_p1), %s2392_s28, 4294967280  ;;  %s3891_s27 = sld [smem:[#allocation8_spill]]  ;;  %s3894_s24 = smov %s3047_s25 }
 0xa3d   : > { %s3892_s17 = sld [smem:[#allocation6_spill]] }
 0xa3e   : > { %s3893_s26 = sld [smem:[#allocation9_spill]] }
 0xa42   : > { %p27_p2 = scmp.ge.s32.totalorder %s3891_s27, 4  }
 0xa43   : > { %s3895_s25 = smov %s3892_s17 }
 0xa44   :  { %29 = sbr.rel (!%p27_p2) target bundleno = 9 (0x9), region = 125 }
 0xa49   :  { %2396 = vsyncpa [#allocation3], 1 }
 0xa4a   :  { %2398 = vsyncpa [#allocation3 + $0x1], 1 }

</bundles_post_ra>
